<compile_context>
chip_gen: v5e
topology: v5e:2x2
jax: 0.10.0
libtpu: 0.0.40
codegen_flags: <defaults>
</compile_context>

<pallas_src>
import functools

import jax
import jax.numpy as jnp
from jax.experimental import pallas as pl
from jax.experimental.pallas import tpu as pltpu


def autoenc_kernel(x_ref,
                   w1_ref, b1_ref, w2_ref, b2_ref, w34_ref, b34_ref,
                   w5_ref, b5_ref, w6_ref, b6_ref,
                   o_ref):
    """One batch tile through all 5 (folded) dense layers + sigmoid epilogue."""
    def dense(h, w_ref, b_ref):
        # bf16 MXU operands, f32 accumulation; bias add / ReLU stay f32 on the VPU.
        return jnp.dot(h.astype(w_ref.dtype), w_ref[...],
                       preferred_element_type=jnp.float32) + b_ref[...]

    h = x_ref[...]
    h = jnp.maximum(dense(h, w1_ref, b1_ref), 0.0)     # encoder L1 + ReLU
    h = jnp.maximum(dense(h, w2_ref, b2_ref), 0.0)     # encoder L2 + ReLU
    h = jnp.maximum(dense(h, w34_ref, b34_ref), 0.0)   # folded (enc L3 @ dec L1) + ReLU
    h = jnp.maximum(dense(h, w5_ref, b5_ref), 0.0)     # decoder L2 + ReLU
    h = dense(h, w6_ref, b6_ref)                       # decoder L3
    # Sigmoid on the EUP (exp + approx reciprocal).  Clamp so exp(-h) can never
    # overflow (also harmless on any garbage rows in a ragged last block).
    h = jnp.clip(h, -30.0, 30.0)
    o_ref[...] = pl.reciprocal(1.0 + jnp.exp(-h), approx=True).astype(o_ref.dtype)


def prepare_params(params, compute_dtype=jnp.bfloat16):
    """One-time (model-load) prep: exact fold of the two adjacent no-activation
    linears (x @ W3 @ W4 + (b3 @ W4 + b4) == x @ W34 + b34, done in f32) and the
    bf16/f32 casts.  Keeps a dozen tiny eager ops out of the per-call path."""
    (w1, b1), (w2, b2), (w3, b3), (w4, b4), (w5, b5), (w6, b6) = params
    w34 = jnp.dot(w3, w4, preferred_element_type=jnp.float32)
    b34 = jnp.dot(b3, w4, preferred_element_type=jnp.float32) + b4
    weights = [w.astype(compute_dtype) for w in (w1, w2, w34, w5, w6)]   # MXU operands
    biases = [b.astype(jnp.float32) for b in (b1, b2, b34, b5, b6)]      # VPU adds
    flat = []
    for w, b in zip(weights, biases):
        flat += [w, b]
    return tuple(flat)


def _pick_tm(batch, tm_max=1024):
    """Largest batch tile <= tm_max (mem-bound: fewer grid steps, better pipeline),
    but keep >= 2 grid steps when possible so v7x's two TensorCores both get work.
    Multiple of 8 (sublane)."""
    half = -(-batch // 2)                 # cdiv(batch, 2)
    tm = max(8, min(tm_max, half))
    return ((tm + 7) // 8) * 8


@functools.partial(jax.jit, static_argnames=("tm",))
def autoenc_forward(x, flat_params, tm=None):
    """x: [B, in_dim] float32; flat_params: output of prepare_params()."""
    B, in_dim = x.shape
    if tm is None:
        tm = _pick_tm(B)
    n_tiles = pl.cdiv(B, tm)   # ragged last block: Pallas pads reads / drops OOB writes

    # x / out: tiled over the batch axis (software-pipelined DMA).  Weights/biases:
    # whole-array blocks with constant index_maps -> fetched once, VMEM-resident.
    in_specs = [pl.BlockSpec((tm, in_dim), lambda i: (i, 0))]
    in_specs += [pl.BlockSpec(a.shape, lambda i: (0, 0)) for a in flat_params]
    # TODO(synk): if xprof shows the x DMA exposed on v5e, add
    # pipeline_mode=pl.Buffered(3) to the x BlockSpec above.

    w_shapes = [flat_params[2 * k].shape for k in range(5)]
    flops = 2 * B * sum(di * do for di, do in w_shapes)
    bytes_accessed = (sum(a.size * a.dtype.itemsize for a in flat_params)
                      + B * in_dim * x.dtype.itemsize     # read x
                      + B * in_dim * 4)                   # write out (f32)
    cost = pl.CostEstimate(flops=flops,
                           transcendentals=2 * B * in_dim,  # exp + reciprocal
                           bytes_accessed=bytes_accessed)

    return pl.pallas_call(
        autoenc_kernel,
        out_shape=jax.ShapeDtypeStruct((B, in_dim), jnp.float32),
        grid=(n_tiles,),
        in_specs=in_specs,
        out_specs=pl.BlockSpec((tm, in_dim), lambda i: (i, 0)),
        compiler_params=pltpu.CompilerParams(
            dimension_semantics=("parallel",)),
        cost_estimate=cost,
    )(x, *flat_params)


def init_params(key, in_dim):
    """Deterministic init matching the PyTorch layer shapes (stored as [in, out])."""
    dims = [in_dim, in_dim // 4, in_dim // 8, in_dim // 16,   # encoder
            in_dim // 8, in_dim // 4, in_dim]                 # decoder
    params = []
    for i in range(6):
        d_in, d_out = dims[i], dims[i + 1]
        key, kw, kb = jax.random.split(key, 3)
        bound = 1.0 / (d_in ** 0.5)
        w = jax.random.uniform(kw, (d_in, d_out), jnp.float32, -bound, bound)
        b = jax.random.uniform(kb, (1, d_out), jnp.float32, -bound, bound)
        params.append((w, b))
    return params


def reference_forward(x, params):
    """Pure-f32 JAX reference with the exact PyTorch semantics (unfolded layers)."""
    h = x
    for i, (w, b) in enumerate(params):
        h = h @ w + b
        if i in (0, 1, 3, 4):      # ReLU after enc L1, enc L2, dec L1, dec L2
            h = jnp.maximum(h, 0.0)
    return jax.nn.sigmoid(h)


if __name__ == "__main__":
    in_dim = 256          # hidden dims: 64 / 32 / 16 / 32 / 64
    batch = 500           # tm picks 256 -> 2 grid steps, ragged last block (masked)
    key = jax.random.PRNGKey(0)
    key, kx = jax.random.split(key)
    x = jax.random.uniform(kx, (batch, in_dim), jnp.float32)

    params = init_params(key, in_dim)
    flat = prepare_params(params)          # one-time fold + casts (model-load time)
    flat = jax.block_until_ready(flat)

    out = autoenc_forward(x, flat)
    out = jax.block_until_ready(out)

    ref = reference_forward(x, params)
    assert out.shape == (batch, in_dim)
    # bf16 MXU operands (f32 accumulate) + approx reciprocal vs f32 reference.
    assert jnp.allclose(out, ref, atol=2e-2, rtol=0.0), "mismatch vs JAX reference"
    print("KERNEL_OK")
</pallas_src>

<mosaic_0001>
module attributes {stable_mosaic.version = 11 : i64} {
  func.func @autoenc_kernel(%arg0: i32, %arg1: memref<256x256xf32, #tpu.memory_space<vmem>>, %arg2: memref<256x64xbf16, #tpu.memory_space<vmem>>, %arg3: memref<1x64xf32, #tpu.memory_space<vmem>>, %arg4: memref<64x32xbf16, #tpu.memory_space<vmem>>, %arg5: memref<1x32xf32, #tpu.memory_space<vmem>>, %arg6: memref<32x32xbf16, #tpu.memory_space<vmem>>, %arg7: memref<1x32xf32, #tpu.memory_space<vmem>>, %arg8: memref<32x64xbf16, #tpu.memory_space<vmem>>, %arg9: memref<1x64xf32, #tpu.memory_space<vmem>>, %arg10: memref<64x256xbf16, #tpu.memory_space<vmem>>, %arg11: memref<1x256xf32, #tpu.memory_space<vmem>>, %arg12: memref<256x256xf32, #tpu.memory_space<vmem>>) attributes {dimension_semantics = [#tpu.dimension_semantics<parallel>], iteration_bounds = array<i64: 2>, scalar_prefetch = 0 : i64, scratch_operands = 0 : i64, tpu.core_type = #tpu.core_type<tc>, window_params = [{transform_indices = @transform_0, window_bounds = array<i64: 256, 256>}, {pipeline_mode = #tpu.pipeline_mode<synchronous>, transform_indices = @transform_1, window_bounds = array<i64: 256, 64>}, {pipeline_mode = #tpu.pipeline_mode<synchronous>, transform_indices = @transform_2, window_bounds = array<i64: 1, 64>}, {pipeline_mode = #tpu.pipeline_mode<synchronous>, transform_indices = @transform_3, window_bounds = array<i64: 64, 32>}, {pipeline_mode = #tpu.pipeline_mode<synchronous>, transform_indices = @transform_4, window_bounds = array<i64: 1, 32>}, {pipeline_mode = #tpu.pipeline_mode<synchronous>, transform_indices = @transform_5, window_bounds = array<i64: 32, 32>}, {pipeline_mode = #tpu.pipeline_mode<synchronous>, transform_indices = @transform_6, window_bounds = array<i64: 1, 32>}, {pipeline_mode = #tpu.pipeline_mode<synchronous>, transform_indices = @transform_7, window_bounds = array<i64: 32, 64>}, {pipeline_mode = #tpu.pipeline_mode<synchronous>, transform_indices = @transform_8, window_bounds = array<i64: 1, 64>}, {pipeline_mode = #tpu.pipeline_mode<synchronous>, transform_indices = @transform_9, window_bounds = array<i64: 64, 256>}, {pipeline_mode = #tpu.pipeline_mode<synchronous>, transform_indices = @transform_10, window_bounds = array<i64: 1, 256>}, {transform_indices = @transform_11, window_bounds = array<i64: 256, 256>}]} {
    %c0 = arith.constant 0 : index
    %c0_0 = arith.constant 0 : index
    %0 = vector.load %arg1[%c0, %c0_0] : memref<256x256xf32, #tpu.memory_space<vmem>>, vector<256x256xf32>
    %1 = arith.truncf %0 : vector<256x256xf32> to vector<256x256xbf16>
    %c0_1 = arith.constant 0 : index
    %c0_2 = arith.constant 0 : index
    %2 = vector.load %arg2[%c0_1, %c0_2] : memref<256x64xbf16, #tpu.memory_space<vmem>>, vector<256x64xbf16>
    %cst = arith.constant dense<0.000000e+00> : vector<256x64xf32>
    %3 = tpu.matmul %1, %2, %cst {dimension_numbers = #tpu.dot_dimension_numbers<[1], [0], [0], [1], [0, 0, 1, 1], [], []>} : vector<256x256xbf16>, vector<256x64xbf16>, vector<256x64xf32> -> vector<256x64xf32>
    %c0_3 = arith.constant 0 : index
    %c0_4 = arith.constant 0 : index
    %4 = vector.load %arg3[%c0_3, %c0_4] : memref<1x64xf32, #tpu.memory_space<vmem>>, vector<1x64xf32>
    %5 = vector.broadcast %4 : vector<1x64xf32> to vector<256x64xf32>
    %6 = arith.addf %3, %5 : vector<256x64xf32>
    %cst_5 = arith.constant 0.000000e+00 : f32
    %7 = vector.broadcast %cst_5 : f32 to vector<256x64xf32>
    %8 = arith.maximumf %6, %7 : vector<256x64xf32>
    %9 = arith.truncf %8 : vector<256x64xf32> to vector<256x64xbf16>
    %c0_6 = arith.constant 0 : index
    %c0_7 = arith.constant 0 : index
    %10 = vector.load %arg4[%c0_6, %c0_7] : memref<64x32xbf16, #tpu.memory_space<vmem>>, vector<64x32xbf16>
    %cst_8 = arith.constant dense<0.000000e+00> : vector<256x32xf32>
    %11 = tpu.matmul %9, %10, %cst_8 {dimension_numbers = #tpu.dot_dimension_numbers<[1], [0], [0], [1], [0, 0, 1, 1], [], []>} : vector<256x64xbf16>, vector<64x32xbf16>, vector<256x32xf32> -> vector<256x32xf32>
    %c0_9 = arith.constant 0 : index
    %c0_10 = arith.constant 0 : index
    %12 = vector.load %arg5[%c0_9, %c0_10] : memref<1x32xf32, #tpu.memory_space<vmem>>, vector<1x32xf32>
    %13 = vector.broadcast %12 : vector<1x32xf32> to vector<256x32xf32>
    %14 = arith.addf %11, %13 : vector<256x32xf32>
    %cst_11 = arith.constant 0.000000e+00 : f32
    %15 = vector.broadcast %cst_11 : f32 to vector<256x32xf32>
    %16 = arith.maximumf %14, %15 : vector<256x32xf32>
    %17 = arith.truncf %16 : vector<256x32xf32> to vector<256x32xbf16>
    %c0_12 = arith.constant 0 : index
    %c0_13 = arith.constant 0 : index
    %18 = vector.load %arg6[%c0_12, %c0_13] : memref<32x32xbf16, #tpu.memory_space<vmem>>, vector<32x32xbf16>
    %cst_14 = arith.constant dense<0.000000e+00> : vector<256x32xf32>
    %19 = tpu.matmul %17, %18, %cst_14 {dimension_numbers = #tpu.dot_dimension_numbers<[1], [0], [0], [1], [0, 0, 1, 1], [], []>} : vector<256x32xbf16>, vector<32x32xbf16>, vector<256x32xf32> -> vector<256x32xf32>
    %c0_15 = arith.constant 0 : index
    %c0_16 = arith.constant 0 : index
    %20 = vector.load %arg7[%c0_15, %c0_16] : memref<1x32xf32, #tpu.memory_space<vmem>>, vector<1x32xf32>
    %21 = vector.broadcast %20 : vector<1x32xf32> to vector<256x32xf32>
    %22 = arith.addf %19, %21 : vector<256x32xf32>
    %cst_17 = arith.constant 0.000000e+00 : f32
    %23 = vector.broadcast %cst_17 : f32 to vector<256x32xf32>
    %24 = arith.maximumf %22, %23 : vector<256x32xf32>
    %25 = arith.truncf %24 : vector<256x32xf32> to vector<256x32xbf16>
    %c0_18 = arith.constant 0 : index
    %c0_19 = arith.constant 0 : index
    %26 = vector.load %arg8[%c0_18, %c0_19] : memref<32x64xbf16, #tpu.memory_space<vmem>>, vector<32x64xbf16>
    %cst_20 = arith.constant dense<0.000000e+00> : vector<256x64xf32>
    %27 = tpu.matmul %25, %26, %cst_20 {dimension_numbers = #tpu.dot_dimension_numbers<[1], [0], [0], [1], [0, 0, 1, 1], [], []>} : vector<256x32xbf16>, vector<32x64xbf16>, vector<256x64xf32> -> vector<256x64xf32>
    %c0_21 = arith.constant 0 : index
    %c0_22 = arith.constant 0 : index
    %28 = vector.load %arg9[%c0_21, %c0_22] : memref<1x64xf32, #tpu.memory_space<vmem>>, vector<1x64xf32>
    %29 = vector.broadcast %28 : vector<1x64xf32> to vector<256x64xf32>
    %30 = arith.addf %27, %29 : vector<256x64xf32>
    %cst_23 = arith.constant 0.000000e+00 : f32
    %31 = vector.broadcast %cst_23 : f32 to vector<256x64xf32>
    %32 = arith.maximumf %30, %31 : vector<256x64xf32>
    %33 = arith.truncf %32 : vector<256x64xf32> to vector<256x64xbf16>
    %c0_24 = arith.constant 0 : index
    %c0_25 = arith.constant 0 : index
    %34 = vector.load %arg10[%c0_24, %c0_25] : memref<64x256xbf16, #tpu.memory_space<vmem>>, vector<64x256xbf16>
    %cst_26 = arith.constant dense<0.000000e+00> : vector<256x256xf32>
    %35 = tpu.matmul %33, %34, %cst_26 {dimension_numbers = #tpu.dot_dimension_numbers<[1], [0], [0], [1], [0, 0, 1, 1], [], []>} : vector<256x64xbf16>, vector<64x256xbf16>, vector<256x256xf32> -> vector<256x256xf32>
    %c0_27 = arith.constant 0 : index
    %c0_28 = arith.constant 0 : index
    %36 = vector.load %arg11[%c0_27, %c0_28] : memref<1x256xf32, #tpu.memory_space<vmem>>, vector<1x256xf32>
    %37 = vector.broadcast %36 : vector<1x256xf32> to vector<256x256xf32>
    %38 = arith.addf %35, %37 : vector<256x256xf32>
    %cst_29 = arith.constant -3.000000e+01 : f32
    %cst_30 = arith.constant 3.000000e+01 : f32
    %39 = vector.broadcast %cst_29 : f32 to vector<256x256xf32>
    %40 = arith.maximumf %39, %38 : vector<256x256xf32>
    %41 = vector.broadcast %cst_30 : f32 to vector<256x256xf32>
    %42 = arith.minimumf %41, %40 : vector<256x256xf32>
    %cst_31 = arith.constant 0.000000e+00 : f32
    %43 = vector.broadcast %cst_31 : f32 to vector<256x256xf32>
    %44 = arith.subf %43, %42 : vector<256x256xf32>
    %45 = math.exp %44 : vector<256x256xf32>
    %cst_32 = arith.constant 1.000000e+00 : f32
    %46 = vector.broadcast %cst_32 : f32 to vector<256x256xf32>
    %47 = arith.addf %46, %45 : vector<256x256xf32>
    %48 = tpu.reciprocal %47 {approx = true} : vector<256x256xf32> -> vector<256x256xf32>
    %c0_33 = arith.constant 0 : index
    %c0_34 = arith.constant 0 : index
    %49 = vector.load %arg12[%c0_33, %c0_34] : memref<256x256xf32, #tpu.memory_space<vmem>>, vector<256x256xf32>
    tpu.vector_store %arg12[%c0_33, %c0_34], %48 {strides = array<i32>} : memref<256x256xf32, #tpu.memory_space<vmem>>, vector<256x256xf32>,
    return
  }
  func.func @transform_0(%arg0: i32) -> (i32, i32) {
    %c0_i32 = arith.constant 0 : i32
    %c0_i32_0 = arith.constant 0 : i32
    return %arg0, %c0_i32 : i32, i32
  }
  func.func @transform_1(%arg0: i32) -> (i32, i32) {
    %c0_i32 = arith.constant 0 : i32
    %c0_i32_0 = arith.constant 0 : i32
    %c0_i32_1 = arith.constant 0 : i32
    return %c0_i32, %c0_i32_0 : i32, i32
  }
  func.func @transform_2(%arg0: i32) -> (i32, i32) {
    %c0_i32 = arith.constant 0 : i32
    %c0_i32_0 = arith.constant 0 : i32
    %c0_i32_1 = arith.constant 0 : i32
    return %c0_i32, %c0_i32_0 : i32, i32
  }
  func.func @transform_3(%arg0: i32) -> (i32, i32) {
    %c0_i32 = arith.constant 0 : i32
    %c0_i32_0 = arith.constant 0 : i32
    %c0_i32_1 = arith.constant 0 : i32
    return %c0_i32, %c0_i32_0 : i32, i32
  }
  func.func @transform_4(%arg0: i32) -> (i32, i32) {
    %c0_i32 = arith.constant 0 : i32
    %c0_i32_0 = arith.constant 0 : i32
    %c0_i32_1 = arith.constant 0 : i32
    return %c0_i32, %c0_i32_0 : i32, i32
  }
  func.func @transform_5(%arg0: i32) -> (i32, i32) {
    %c0_i32 = arith.constant 0 : i32
    %c0_i32_0 = arith.constant 0 : i32
    %c0_i32_1 = arith.constant 0 : i32
    return %c0_i32, %c0_i32_0 : i32, i32
  }
  func.func @transform_6(%arg0: i32) -> (i32, i32) {
    %c0_i32 = arith.constant 0 : i32
    %c0_i32_0 = arith.constant 0 : i32
    %c0_i32_1 = arith.constant 0 : i32
    return %c0_i32, %c0_i32_0 : i32, i32
  }
  func.func @transform_7(%arg0: i32) -> (i32, i32) {
    %c0_i32 = arith.constant 0 : i32
    %c0_i32_0 = arith.constant 0 : i32
    %c0_i32_1 = arith.constant 0 : i32
    return %c0_i32, %c0_i32_0 : i32, i32
  }
  func.func @transform_8(%arg0: i32) -> (i32, i32) {
    %c0_i32 = arith.constant 0 : i32
    %c0_i32_0 = arith.constant 0 : i32
    %c0_i32_1 = arith.constant 0 : i32
    return %c0_i32, %c0_i32_0 : i32, i32
  }
  func.func @transform_9(%arg0: i32) -> (i32, i32) {
    %c0_i32 = arith.constant 0 : i32
    %c0_i32_0 = arith.constant 0 : i32
    %c0_i32_1 = arith.constant 0 : i32
    return %c0_i32, %c0_i32_0 : i32, i32
  }
  func.func @transform_10(%arg0: i32) -> (i32, i32) {
    %c0_i32 = arith.constant 0 : i32
    %c0_i32_0 = arith.constant 0 : i32
    %c0_i32_1 = arith.constant 0 : i32
    return %c0_i32, %c0_i32_0 : i32, i32
  }
  func.func @transform_11(%arg0: i32) -> (i32, i32) {
    %c0_i32 = arith.constant 0 : i32
    %c0_i32_0 = arith.constant 0 : i32
    return %arg0, %c0_i32 : i32, i32
  }
}

</mosaic_0001>

<bundles_post_ra>
// kernel: autoenc_forward.1
= control target key start
LH: loop header
LB: loop body
LE: loop exit
PB: predicated region body
PF: predicated region fallthrough
CT: control target
= control target key end

     0   :  { %s4044_s0 = inlined_call_operand.hbm [shape: f32[500,256], index: 0, kind: input, shape index: {}]   ;;  %s4045_s1 = inlined_call_operand.vmem [shape: bf16[256,64], index: 1, kind: input, shape index: {}]   ;;  %s4046_s2 = inlined_call_operand.vmem [shape: f32[1,64], index: 2, kind: input, shape index: {}]   ;;  %s4047_s3 = inlined_call_operand.vmem [shape: bf16[64,32], index: 3, kind: input, shape index: {}]   ;;  %s4048_s4 = inlined_call_operand.vmem [shape: f32[1,32], index: 4, kind: input, shape index: {}]   ;;  %s4049_s5 = inlined_call_operand.vmem [shape: bf16[32,32], index: 5, kind: input, shape index: {}]   ;;  %s4050_s6 = inlined_call_operand.vmem [shape: f32[1,32], index: 6, kind: input, shape index: {}]   ;;  %s4051_s7 = inlined_call_operand.vmem [shape: bf16[32,64], index: 7, kind: input, shape index: {}]   ;;  %s4052_s8 = inlined_call_operand.vmem [shape: f32[1,64], index: 8, kind: input, shape index: {}]   ;;  %s4053_s9 = inlined_call_operand.vmem [shape: bf16[64,256], index: 9, kind: input, shape index: {}]   ;;  %s4054_s10 = inlined_call_operand.vmem [shape: f32[1,256], index: 10, kind: input, shape index: {}]   ;;  %s4055_s11 = inlined_call_operand.hbm [shape: f32[500,256], index: 11, kind: output, shape index: {}]  }
   0x1   :  { %4065 = sst [smem:[#allocation13_spill]] %s4055_s11 }
   0x2   :  { %16 = vsyncpa [#allocation3], 0 }
   0x3   :  { %18 = vsyncpa [#allocation3 + $0x1], 0 }
   0x4   :  { %19 = vsyncpa [#allocation4], 0 }
   0x5   :  { %21 = vsyncpa [#allocation4 + $0x1], 0  ;;  %s3243_s17 = smov 0   ;;  %s3245_s18 = smov 0  }
   0x6   :  { %s3247_s19 = smov 0   ;;  %s3249_s20 = smov 0  }
   0x7 LB: > { %4066 = sst [smem:[#allocation8_spill]] %s3163_s17  ;;  %s3264_s21 = sadd.s32 4294967295, %s3175_s20   ;;  %s3175_s20 = sphi %s3249_s20, %s4082_s20   ;;  %s3171_s19 = sphi %s3247_s19, %s4084_s19   ;;  %s3167_s18 = sphi %s3245_s18, %s4086_s18   ;;  %s3163_s17 = sphi %s3243_s17, %s4085_s17  }
   0x8   : > { %4067 = sst [smem:[#allocation9_spill]] %s3171_s19  ;;  %s2406_s22 = sadd.s32 4294967294, %s3175_s20  }
   0x9   : > { %s3268_s23 = sadd.s32 1, %s3175_s20   ;;  %s34_s24 = sadd.s32 1, %s3171_s19 }
   0xa   : > { %4068 = sst [smem:[#allocation10_spill]] %s3268_s23  ;;  %s31_s25 = ssub.s32 %s3175_s20, %s3268_s23 }
   0xb   : > { %p41_p0 = scmp.ne.s32.totalorder %s3171_s19, %s3167_s18  ;;  %p32_p1 = scmp.eq.s32.totalorder %s31_s25, 0 }
   0xc   : > { %p42_p2 = scmp.eq.s32.totalorder %s3175_s20, 0  ;;  %p47_p3 = scmp.ne.s32.totalorder %s3167_s18, %s3163_s17 }
   0xd   : > { %p48_p4 = scmp.eq.s32.totalorder %s3264_s21, 0  ;;  %p281_p7 = scmp.eq.s32.totalorder %s3264_s21, 1 }
   0xe   : > { %s3280_s26 = scalar_select %p32_p1, %s3171_s19, %s34_s24  }
   0xf   : > { %p43_p5 = por %p42_p2, %p41_p0  ;;  %p3282_p6 = por %p48_p4, %p47_p3 }
  0x10   : > { %4069 = sst [smem:[#allocation11_spill]] %s3280_s26  ;;  %p287_p8 = scmp.eq.s32.totalorder %s2406_s22, 1 }
  0x11   : > { %p3287_p9 = por %p281_p7, %p41_p0  ;;  %p4063_p11 = scmp.ge.s32.totalorder %s3175_s20, 2 }
  0x12   : > { %p3291_p10 = por %p287_p8, %p47_p3 }
  0x13   : > { %333 = sbr.rel (%p4063_p11) target bundleno = 61 (0x3d), region = 56 }
  0x14   : > { %s4072_s29 = scalar_select %p3291_p10, 1, 0 }
  0x16   : > { %4073 = sst [smem:[#allocation12_spill]] %s4072_s29 }
  0x18   : > { %336 = sbr.rel (!%p43_p5) target bundleno = 61 (0x3d), region = 60  ;;  %s337_s30 = sand.u32 (%p43_p5), 1, %s3171_s19  }
  0x19   : > { %s2410_s12 = sshll.u32 (%p43_p5), %s3175_s20, 5  ;;  %s2409_s13 = sshll.u32 (%p43_p5), %s337_s30, 9 }
  0x1a   : > { %s343_s14 = ssub.s32 (%p43_p5), 63, %s2410_s12  ;;  %s3303_s24 = scalar_lea.sflag (%p43_p5), [#allocation3], %s337_s30 }
  0x1b   : > { %p344_p12 = scmp.lt.s32.totalorder (%p43_p5), %s343_s14, 32  ;;  %s341_s25 = scalar_lea.vmem (%p43_p5), [#allocation2], %s2409_s13 }
  0x1d   : > { %s4088_s14 = smov (!%p344_p12, %s343_s14), 32 }
  0x1e   : > { %s2704_s15 = sshll.u32 %s4088_s14, 4 }
  0x1f   : > { %s348_s16 = ssub.s32 512, %s2704_s15 }
  0x20   : > { %s349_s22 = sshll.u32 %s348_s16, 4 }
  0x21   : > { %350 = vsyncadd %s3303_s24, %s349_s22  ;;  %p3306_p13 = scmp.ne.s32.totalorder %s2704_s15, 0  ;;  %s2706_s12 = sshll.u32 %s3175_s20, 9 }
  0x22   : > { %s354_s29 = scalar_lea.hbm %s4044_s0, %s2706_s12  ;;  %s3314_s17 = sshll.u32 %s341_s25, 4  ;;  %s359_s17 = int_to_ptr.vmem [resolvable:$true] %s3314_s17 }
  0x23   : > { %s356_s30 = sshll.u32 %s354_s29, 4  ;;  %s4061_s13 = sshll.u32 %s4088_s14, 8  ;;  %s3317_s30 = int_to_ptr.hbm [resolvable:$true] %s356_s30 }
  0x24   : > { %s3059_s16 = sshra.s32 %s3317_s30, 4  ;;  %s3061_s15 = sshrl.u32 %s4061_s13, 4  ;;  %s3060_s16 = int_to_ptr.hbm [resolvable:$true] %s3059_s16 }
  0x25   : > { %s3066_s22 = scalar_lea.hbm %s3060_s16, %s3061_s15  ;;  %s3070_s25 = scalar_lea.hbm %s4044_s0, 1008 }
  0x26   : > { %p3067_p0 = scmp.ne.s32.totalorder %s3060_s16, %s3066_s22  ;;  %p3071_p3 = scmp.lt.s32.totalorder %s3060_s16, %s4044_s0 }
  0x27   : > { %p3072_p4 = scmp.lt.s32.totalorder %s3070_s25, %s3066_s22 }
  0x28   : > { %p3068_p1 = pnand %p3067_p0, %p3306_p13 }
  0x29   : > { %p3073_p5 = por %p3072_p4, %p3071_p3 }
  0x2a   : > { %p3069_p2 = pneg %p3068_p1 }
  0x2c   : > { %p3074_p7 = pnand %p3073_p5, %p3069_p2 }
  0x2e   : > { %3077 = shalt.err (!%p3074_p7)
}
  0x2f   : > { %s3078_s13 = sshra.s32 %s359_s17, 4  ;;  %s3177_s19 = smov [#allocation2]   ;;  %s3079_s13 = int_to_ptr.vmem [resolvable:$true] %s3078_s13 }
  0x30   : > { %s3085_s11 = scalar_lea.vmem %s3079_s13, %s3061_s15  ;;  %s3089_s23 = scalar_lea.vmem %s3177_s19, 1024 }
  0x31   : > { %p3086_p8 = scmp.ne.s32.totalorder %s3079_s13, %s3085_s11  ;;  %p3091_p1 = scmp.lt.s32.totalorder %s3089_s23, %s3085_s11 }
  0x33   : > { %p3087_p12 = pnand %p3086_p8, %p3306_p13 }
  0x35   : > { %p3088_p0 = pneg %p3087_p12 }
  0x37   : > { %p3093_p11 = pnand %p3091_p1, %p3088_p0 }
  0x39   : > { %3096 = shalt.err (!%p3093_p11)
}
  0x3a   : > { %s3178_s16 = smov 256   ;;  %s3179_s22 = smov 16  }
  0x3b   : > { %s4075_s25 = sshll.u32 %s4088_s14, 8 }
  0x3c   : > { %364 = dma.hbm_to_vmem [thread:$0]  (%p3306_p13), %s3317_s30, %s4075_s25, %s359_s17, %s3303_s24, %s3178_s16, %s3178_s16, %s3179_s22  }
  0x3d PF: > { %p2418_p2 = scmp.ge.s32.totalorder %s3175_s20, 1  ;;  %p366_p3 = scmp.lt.s32.totalorder %s3175_s20, 3 }
  0x3f   : > { %p367_p4 = pnand %p2418_p2, %p366_p3 }
  0x40   : > { %s3346_s11 = sand.u32 (!%p367_p4), 1, %s3167_s18  }
  0x41   : > { %370 = sbr.rel (%p367_p4) target bundleno = 1292 (0x50c), region = 64  ;;  %s2419_s13 = sshll.u32 (!%p367_p4), %s3346_s11, 9 }
  0x42   : > { %s373_s26 = scalar_lea.sflag (!%p367_p4), [#allocation3], %s3346_s11  ;;  %s3352_s14 = scalar_lea.vmem (!%p367_p4), [#allocation2], %s2419_s13 }
  0x46   : > { %3154 = dma.done.wait (%p3282_p6), %s373_s26, 8192  }
  0x47   : > { %3156 = vsyncadd (%p3282_p6), %s373_s26, 4294959104  ;;  %v2714_v0 = vld [vmem:[%s4045_s1 + $0x38] sm:$0xff]  ;;  %v2713_v1 = vld [vmem:[%s4045_s1 + $0x30] sm:$0xff]  ;;  %vm919_vm0 = vcmask 523264   ;;  %vm1125_vm1 = vcmask 261120   ;;  %s3833_s23 = scalar_lea.vmem [#allocation5], %s2419_s13 }
  0x48   : > { %2742 = vmatpush.bf16.msra.mxu1 %v2714_v0  ;;  %657 = vmatpush.bf16.msra.mxu0 %v2714_v0  ;;  %v2712_v2 = vld [vmem:[%s4045_s1 + $0x28] sm:$0xff]  ;;  %v2711_v3 = vld [vmem:[%s4045_s1 + $0x20] sm:$0xff]  ;;  %v2710_v4 = vld [vmem:[%s4045_s1 + $0x18] sm:$0xff]  ;;  %s2309_s13 = scalar_lea.sflag [#allocation4], %s3346_s11  ;;  %s2694_s16 = sshll.u32 (%p3287_p9), %s3264_s21, 5 }
  0x49   : > { %v2709_v5 = vld [vmem:[%s4045_s1 + $0x10] sm:$0xff]  ;;  %v2708_v6 = vld [vmem:[%s4045_s1 + $0x8] sm:$0xff]  ;;  %v2707_v7 = vld [vmem:[%s4045_s1] sm:$0xff]  ;;  %s2317_s22 = ssub.s32 (%p3287_p9), 63, %s2694_s16 }
  0x4a   : > { %v477_v8 = vld [vmem:[%s3352_s14 + $0x180] sm:$0xff]  ;;  %v479_v9 = vld [vmem:[%s3352_s14 + $0x190] sm:$0xff]  ;;  %v2722_v10 = vld [vmem:[%s4045_s1 + $0x78] sm:$0xff]  ;;  %p2318_p6 = scmp.lt.s32.totalorder (%p3287_p9), %s2317_s22, 32 }
  0x4b   : > { %v517_v11 = vpack.c.bf16 %v479_v9, %v477_v8  ;;  %v2721_v12 = vld [vmem:[%s4045_s1 + $0x70] sm:$0xff]  ;;  %v2720_v13 = vld [vmem:[%s4045_s1 + $0x68] sm:$0xff]  ;;  %v2719_v14 = vld [vmem:[%s4045_s1 + $0x60] sm:$0xff] }
  0x4c   : > { %2743 = vmatpush.bf16.msra.mxu1 %v2713_v1  ;;  %658 = vmatpush.bf16.msra.mxu0 %v2713_v1  ;;  %v481_v15 = vld [vmem:[%s3352_s14 + $0x1a0] sm:$0xff]  ;;  %v483_v16 = vld [vmem:[%s3352_s14 + $0x1b0] sm:$0xff]  ;;  %v2718_v17 = vld [vmem:[%s4045_s1 + $0x58] sm:$0xff] }
  0x4d   : > { %v519_v18 = vpack.c.bf16 %v483_v16, %v481_v15  ;;  %v2717_v19 = vld [vmem:[%s4045_s1 + $0x50] sm:$0xff]  ;;  %v429_v20 = vld [vmem:[%s3352_s14] sm:$0xff]  ;;  %v2716_v23 = vld [vmem:[%s4045_s1 + $0x48] sm:$0xff] }
  0x4e   : > { %v431_v21 = vld [vmem:[%s3352_s14 + $0x10] sm:$0xff]  ;;  %v2715_v24 = vld [vmem:[%s4045_s1 + $0x40] sm:$0xff]  ;;  %v2726_v30 = vld [vmem:[%s4047_s3 + $0x18] sm:$0xff] }
  0x4f   : > { %v493_v22 = vpack.c.bf16 %v431_v21, %v429_v20  ;;  %v485_v25 = vld [vmem:[%s3352_s14 + $0x1c0] sm:$0xff]  ;;  %v487_v26 = vld [vmem:[%s3352_s14 + $0x1d0] sm:$0xff]  ;;  %2750 = vmatpush.bf16.msra.mxu2 %v2726_v30  ;;  %v430_v38 = vld [vmem:[%s3352_s14 + $0x8] sm:$0xff] }
  0x50   : > { %2744 = vmatpush.bf16.msra.mxu1 %v2712_v2  ;;  %659 = vmatpush.bf16.msra.mxu0 %v2712_v2  ;;  %v521_v27 = vpack.c.bf16 %v487_v26, %v485_v25  ;;  %v433_v28 = vld [vmem:[%s3352_s14 + $0x20] sm:$0xff]  ;;  %v435_v29 = vld [vmem:[%s3352_s14 + $0x30] sm:$0xff]  ;;  %v432_v39 = vld [vmem:[%s3352_s14 + $0x18] sm:$0xff] }
  0x51   : > { %v495_v31 = vpack.c.bf16 %v435_v29, %v433_v28  ;;  %v489_v32 = vld [vmem:[%s3352_s14 + $0x1e0] sm:$0xff]  ;;  %v491_v33 = vld [vmem:[%s3352_s14 + $0x1f0] sm:$0xff]  ;;  %v494_v40 = vpack.c.bf16 %v432_v39, %v430_v38  ;;  %v434_v44 = vld [vmem:[%s3352_s14 + $0x28] sm:$0xff] }
  0x52   : > { %v523_v34 = vpack.c.bf16 %v491_v33, %v489_v32  ;;  %v437_v35 = vld [vmem:[%s3352_s14 + $0x40] sm:$0xff]  ;;  %v439_v36 = vld [vmem:[%s3352_s14 + $0x50] sm:$0xff]  ;;  %v436_v45 = vld [vmem:[%s3352_s14 + $0x38] sm:$0xff] }
  0x53   : > { %v497_v37 = vpack.c.bf16 %v439_v36, %v437_v35  ;;  %v441_v41 = vld [vmem:[%s3352_s14 + $0x60] sm:$0xff]  ;;  %v443_v42 = vld [vmem:[%s3352_s14 + $0x70] sm:$0xff]  ;;  %v496_v46 = vpack.c.bf16 %v436_v45, %v434_v44  ;;  %v438_v50 = vld [vmem:[%s3352_s14 + $0x48] sm:$0xff] }
  0x54   : > { %2745 = vmatpush.bf16.msra.mxu1 %v2711_v3  ;;  %660 = vmatpush.bf16.msra.mxu0 %v2711_v3  ;;  %v499_v43 = vpack.c.bf16 %v443_v42, %v441_v41  ;;  %v445_v47 = vld [vmem:[%s3352_s14 + $0x80] sm:$0xff]  ;;  %v447_v48 = vld [vmem:[%s3352_s14 + $0x90] sm:$0xff]  ;;  %v440_v51 = vld [vmem:[%s3352_s14 + $0x58] sm:$0xff] }
  0x55   : > { %v501_v49 = vpack.c.bf16 %v447_v48, %v445_v47  ;;  %v498_v52 = vpack.c.bf16 %v440_v51, %v438_v50  ;;  %v449_v53 = vld [vmem:[%s3352_s14 + $0xa0] sm:$0xff]  ;;  %v451_v54 = vld [vmem:[%s3352_s14 + $0xb0] sm:$0xff]  ;;  %v442_v57 = vld [vmem:[%s3352_s14 + $0x68] sm:$0xff] }
  0x56   : > { %v503_v55 = vpack.c.bf16 %v451_v54, %v449_v53  ;;  %v2725_v56 = vld [vmem:[%s4047_s3 + $0x10] sm:$0xff]  ;;  %v444_v58 = vld [vmem:[%s3352_s14 + $0x78] sm:$0xff]  ;;  %v453_v60 = vld [vmem:[%s3352_s14 + $0xc0] sm:$0xff] }
  0x57   : > { %2751 = vmatpush.bf16.msra.mxu2 %v2725_v56  ;;  %v500_v59 = vpack.c.bf16 %v444_v58, %v442_v57  ;;  %v455_v61 = vld [vmem:[%s3352_s14 + $0xd0] sm:$0xff]  ;;  %v446_v63 = vld [vmem:[%s3352_s14 + $0x88] sm:$0xff]  ;;  %v448_v0 = vld [vmem:[%s3352_s14 + $0x98] sm:$0xff] }
  0x58   : > { %2746 = vmatpush.bf16.msra.mxu1 %v2710_v4  ;;  %661 = vmatpush.bf16.msra.mxu0 %v2710_v4  ;;  %v505_v62 = vpack.c.bf16 %v455_v61, %v453_v60  ;;  %v502_v1 = vpack.c.bf16 %v448_v0, %v446_v63  ;;  %v457_v3 = vld [vmem:[%s3352_s14 + $0xe0] sm:$0xff]  ;;  %v459_v4 = vld [vmem:[%s3352_s14 + $0xf0] sm:$0xff]  ;;  %v452_v8 = vld [vmem:[%s3352_s14 + $0xb8] sm:$0xff] }
  0x59   : > { %v458_v26 = vld [vmem:[%s3352_s14 + $0xe8] sm:$0xff]  ;;  %v469_v33 = vld [vmem:[%s3352_s14 + $0x140] sm:$0xff]  ;;  %v464_v39 = vld [vmem:[%s3352_s14 + $0x118] sm:$0xff] }
  0x5a   : > { %v2724_v28 = vld [vmem:[%s4047_s3 + $0x8] sm:$0xff]  ;;  %v473_v45 = vld [vmem:[%s3352_s14 + $0x160] sm:$0xff] }
  0x5b   : > { %2752 = vmatpush.bf16.msra.mxu2 %v2724_v28  ;;  %v462_v38 = vld [vmem:[%s3352_s14 + $0x108] sm:$0xff] }
  0x5c   : > { %2747 = vmatpush.bf16.msra.mxu1 %v2709_v5  ;;  %662 = vmatpush.bf16.msra.mxu0 %v2709_v5  ;;  %v507_v5 = vpack.c.bf16 %v459_v4, %v457_v3  ;;  %v510_v41 = vpack.c.bf16 %v464_v39, %v462_v38  ;;  %v466_v54 = vld [vmem:[%s3352_s14 + $0x128] sm:$0xff] }
  0x60   : > { %2748 = vmatpush.bf16.msra.mxu1 %v2708_v6  ;;  %663 = vmatpush.bf16.msra.mxu0 %v2708_v6 }
  0x64   : > { %2749 = vmatpush.bf16.msra.mxu1 %v2707_v7  ;;  %664 = vmatpush.bf16.msra.mxu0 %v2707_v7  ;;  %v450_v7 = vld [vmem:[%s3352_s14 + $0xa8] sm:$0xff] }
  0x65   : > { %v504_v9 = vpack.c.bf16 %v452_v8, %v450_v7  ;;  %v472_v7 = vld [vmem:[%s3352_s14 + $0x158] sm:$0xff] }
  0x67   : > { %725 = vmatmul.bf16.vlgmr.msra.gmra.mxu1 %v517_v11  ;;  %665 = vmatmul.bf16.vlgmr.msra.gmra.mxu0 %v493_v22  ;;  %v465_v22 = vld [vmem:[%s3352_s14 + $0x120] sm:$0xff] }
  0x68   : > { %746 = vmatpush.bf16.msrb.mxu1 %v2722_v10 }
  0x6c   : > { %747 = vmatpush.bf16.msrb.mxu1 %v2721_v12  ;;  %v461_v12 = vld [vmem:[%s3352_s14 + $0x100] sm:$0xff] }
  0x70   : > { %748 = vmatpush.bf16.msrb.mxu1 %v2720_v13  ;;  %v463_v13 = vld [vmem:[%s3352_s14 + $0x110] sm:$0xff] }
  0x74   : > { %749 = vmatpush.bf16.msrb.mxu1 %v2719_v14  ;;  %v509_v14 = vpack.c.bf16 %v463_v13, %v461_v12 }
  0x77   : > { %730 = vmatmul.bf16.gmra.mxu1 %v519_v18  ;;  %670 = vmatmul.bf16.gmra.mxu0 %v495_v31  ;;  %v456_v18 = vld [vmem:[%s3352_s14 + $0xd8] sm:$0xff] }
  0x78   : > { %750 = vmatpush.bf16.msrb.mxu1 %v2718_v17  ;;  %v454_v17 = vld [vmem:[%s3352_s14 + $0xc8] sm:$0xff] }
  0x7c   : > { %751 = vmatpush.bf16.msrb.mxu1 %v2717_v19  ;;  %v506_v19 = vpack.c.bf16 %v456_v18, %v454_v17 }
  0x80   : > { %752 = vmatpush.bf16.msrb.mxu1 %v2716_v23  ;;  %v467_v23 = vld [vmem:[%s3352_s14 + $0x130] sm:$0xff] }
  0x84   : > { %753 = vmatpush.bf16.msrb.mxu1 %v2715_v24  ;;  %v511_v24 = vpack.c.bf16 %v467_v23, %v465_v22  ;;  %v474_v23 = vld [vmem:[%s3352_s14 + $0x168] sm:$0xff] }
  0x87   : > { %735 = vmatmul.bf16.gmra.mxu1 %v521_v27  ;;  %675 = vmatmul.bf16.gmra.mxu0 %v497_v37  ;;  %v460_v27 = vld [vmem:[%s3352_s14 + $0xf8] sm:$0xff]  ;;  %v3480_v37 = vld [vmem:[%s4046_s2] ss:$0 sm:$0xff] }
  0x88   : > { %972 = vmatpush.bf16.msra.mxu1 %v2726_v30  ;;  %v508_v30 = vpack.c.bf16 %v460_v27, %v458_v26 }
  0x8c   : > { %973 = vmatpush.bf16.msra.mxu1 %v2725_v56 }
  0x90   : > { %974 = vmatpush.bf16.msra.mxu1 %v2724_v28 }
  0x97   : > { %740 = vmatmul.bf16.gmra.mxu1 %v523_v34  ;;  %680 = vmatmul.bf16.gmra.mxu0 %v499_v43  ;;  %v471_v34 = vld [vmem:[%s3352_s14 + $0x150] sm:$0xff] }
  0x98   : > { %v513_v35 = vpack.c.bf16 %v471_v34, %v469_v33 }
  0xa7   : > { %754 = vmatmul.bf16.vlgmr.msrb.gmra.mxu1 %v494_v40  ;;  %685 = vmatmul.bf16.gmra.mxu0 %v501_v49 }
  0xb7   : > { %759 = vmatmul.bf16.gmra.mxu1 %v496_v46  ;;  %690 = vmatmul.bf16.gmra.mxu0 %v503_v55  ;;  %v475_v46 = vld [vmem:[%s3352_s14 + $0x170] sm:$0xff]  ;;  %v468_v55 = vld [vmem:[%s3352_s14 + $0x138] sm:$0xff] }
  0xb8   : > { %v515_v48 = vpack.c.bf16 %v475_v46, %v473_v45  ;;  %v512_v58 = vpack.c.bf16 %v468_v55, %v466_v54  ;;  %v482_v54 = vld [vmem:[%s3352_s14 + $0x1a8] sm:$0xff]  ;;  %v484_v55 = vld [vmem:[%s3352_s14 + $0x1b8] sm:$0xff] }
  0xc7   : > { %764 = vmatmul.bf16.gmra.mxu1 %v498_v52  ;;  %695 = vmatmul.bf16.gmra.mxu0 %v505_v62 }
  0xd7   : > { %769 = vmatmul.bf16.gmra.mxu1 %v500_v59  ;;  %700 = vmatmul.bf16.gmra.mxu0 %v507_v5  ;;  %v470_v5 = vld [vmem:[%s3352_s14 + $0x148] sm:$0xff] }
  0xd8   : > { %v514_v12 = vpack.c.bf16 %v472_v7, %v470_v5  ;;  %v486_v7 = vld [vmem:[%s3352_s14 + $0x1c8] sm:$0xff] }
  0xe4   : > { %v3444_v2 = vpop.f32.mrf.mxu1  ;;  %v666_v11 = vpop.f32.mrf.mxu0 }
  0xe5   : > { %v667_v40 = vadd.f32 %v3480_v37, %v666_v11 }
  0xe7   : > { %774 = vmatmul.bf16.gmra.mxu1 %v502_v1  ;;  %705 = vmatmul.bf16.gmra.mxu0 %v509_v14  ;;  %v2723_v1 = vld [vmem:[%s4047_s3] sm:$0xff] }
  0xe8   : > { %2753 = vmatpush.bf16.msra.mxu2 %v2723_v1  ;;  %975 = vmatpush.bf16.msra.mxu1 %v2723_v1 }
  0xec   : > { %v3448_v6 = vpop.f32.mrf.mxu1  ;;  %v668_v16 = vpop.f32.mrf.mxu0 }
  0xed   : > { %v669_v47 = vadd.f32 %v3480_v37, %v668_v16 }
  0xf4   : > { %v3452_v10 = vpop.f32.mrf.mxu1  ;;  %v671_v21 = vpop.f32.mrf.mxu0 }
  0xf5   : > { %v672_v56 = vadd.f32 %v3480_v37, %v671_v21 }
  0xf7   : > { %779 = vmatmul.bf16.gmra.mxu1 %v504_v9  ;;  %710 = vmatmul.bf16.gmra.mxu0 %v511_v24  ;;  %v476_v24 = vld [vmem:[%s3352_s14 + $0x178] sm:$0xff] }
  0xf8   : > { %v516_v27 = vpack.c.bf16 %v476_v24, %v474_v23  ;;  %v490_v24 = vld [vmem:[%s3352_s14 + $0x1e8] sm:$0xff] }
  0xfc   : > { %v3456_v15 = vpop.f32.mrf.mxu1  ;;  %v673_v29 = vpop.f32.mrf.mxu0 }
  0xfd   : > { %v674_v62 = vadd.f32 %v3480_v37, %v673_v29 }
 0x104   : > { %v3460_v20 = vpop.f32.mrf.mxu1  ;;  %v676_v32 = vpop.f32.mrf.mxu0 }
 0x105   : > { %v677_v8 = vadd.f32 %v3480_v37, %v676_v32 }
 0x107   : > { %784 = vmatmul.bf16.gmra.mxu1 %v506_v19  ;;  %715 = vmatmul.bf16.gmra.mxu0 %v513_v35 }
 0x10c   : > { %v3464_v25 = vpop.f32.mrf.mxu1  ;;  %v678_v43 = vpop.f32.mrf.mxu0 }
 0x10d   : > { %v679_v16 = vadd.f32 %v3480_v37, %v678_v43 }
 0x114   : > { %v3471_v31 = vpop.f32.mrf.mxu1  ;;  %v681_v51 = vpop.f32.mrf.mxu0 }
 0x117   : > { %789 = vmatmul.bf16.gmra.mxu1 %v508_v30  ;;  %720 = vmatmul.bf16.gmra.mxu0 %v515_v48  ;;  %v682_v30 = vadd.f32 %v3480_v37, %v681_v51 }
 0x11c   : > { %v3475_v36 = vpop.f32.mrf.mxu1  ;;  %v683_v61 = vpop.f32.mrf.mxu0 }
 0x11d   : > { %v684_v32 = vadd.f32 %v3480_v37, %v683_v61 }
 0x124   : > { %v755_v42 = vpop.f32.mrf.mxu1  ;;  %v686_v11 = vpop.f32.mrf.mxu0 }
 0x125   : > { %v756_v44 = vadd.f32 %v755_v42, %v667_v40  ;;  %v478_v40 = vld [vmem:[%s3352_s14 + $0x188] sm:$0xff]  ;;  %v687_v46 = vadd.f32 %v3480_v37, %v686_v11 }
 0x127   : > { %794 = vmatmul.bf16.gmra.mxu1 %v510_v41  ;;  %v835_v52 = vmax.f32 %v756_v44, 0.0  ;;  %v480_v41 = vld [vmem:[%s3352_s14 + $0x198] sm:$0xff] }
 0x128   : > { %v518_v44 = vpack.c.bf16 %v480_v41, %v478_v40 }
 0x12c   : > { %v757_v49 = vpop.f32.mrf.mxu1  ;;  %v688_v18 = vpop.f32.mrf.mxu0 }
 0x12d   : > { %v758_v50 = vadd.f32 %v757_v49, %v669_v47  ;;  %v689_v48 = vadd.f32 %v3480_v37, %v688_v18 }
 0x12f   : > { %v836_v53 = vmax.f32 %v758_v50, 0.0 }
 0x131   : > { %v3491_v57 = vpack.c.bf16 %v836_v53, %v835_v52 }
 0x134   : > { %v760_v59 = vpop.f32.mrf.mxu1  ;;  %v691_v29 = vpop.f32.mrf.mxu0 }
 0x135   : > { %v761_v60 = vadd.f32 %v760_v59, %v672_v56  ;;  %v692_v61 = vadd.f32 %v3480_v37, %v691_v29 }
 0x137   : > { %799 = vmatmul.bf16.gmra.mxu1 %v512_v58  ;;  %v837_v3 = vmax.f32 %v761_v60, 0.0  ;;  %v520_v58 = vpack.c.bf16 %v484_v55, %v482_v54 }
 0x13c   : > { %v762_v63 = vpop.f32.mrf.mxu1  ;;  %v693_v42 = vpop.f32.mrf.mxu0 }
 0x13d   : > { %v763_v0 = vadd.f32 %v762_v63, %v674_v62  ;;  %v694_v62 = vadd.f32 %v3480_v37, %v693_v42 }
 0x13f   : > { %v838_v4 = vmax.f32 %v763_v0, 0.0 }
 0x141   : > { %v3500_v9 = vpack.c.bf16 %v838_v4, %v837_v3 }
 0x144   : > { %v765_v13 = vpop.f32.mrf.mxu1  ;;  %v696_v47 = vpop.f32.mrf.mxu0 }
 0x145   : > { %v766_v14 = vadd.f32 %v765_v13, %v677_v8  ;;  %v488_v8 = vld [vmem:[%s3352_s14 + $0x1d8] sm:$0xff] }
 0x147   : > { %804 = vmatmul.bf16.gmra.mxu1 %v514_v12  ;;  %v839_v21 = vmax.f32 %v766_v14, 0.0  ;;  %v522_v12 = vpack.c.bf16 %v488_v8, %v486_v7  ;;  %v697_v14 = vadd.f32 %v3480_v37, %v696_v47  ;;  %v2728_v8 = vld [vmem:[%s4049_s5 + $0x8] sm:$0xff] }
 0x148   : > { %2754 = vmatpush.bf16.msra.mxu3 %v2728_v8  ;;  %1180 = vmatpush.bf16.msrb.mxu1 %v2728_v8 }
 0x14c   : > { %v767_v17 = vpop.f32.mrf.mxu1  ;;  %v698_v60 = vpop.f32.mrf.mxu0 }
 0x14d   : > { %v768_v19 = vadd.f32 %v767_v17, %v679_v16  ;;  %v699_v17 = vadd.f32 %v3480_v37, %v698_v60 }
 0x14f   : > { %v840_v22 = vmax.f32 %v768_v19, 0.0 }
 0x151   : > { %v3505_v26 = vpack.c.bf16 %v840_v22, %v839_v21 }
 0x154   : > { %v770_v28 = vpop.f32.mrf.mxu1  ;;  %v701_v3 = vpop.f32.mrf.mxu0 }
 0x155   : > { %v771_v33 = vadd.f32 %v770_v28, %v682_v30 }
 0x157   : > { %809 = vmatmul.bf16.gmra.mxu1 %v516_v27  ;;  %v841_v38 = vmax.f32 %v771_v33, 0.0  ;;  %v492_v27 = vld [vmem:[%s3352_s14 + $0x1f8] sm:$0xff]  ;;  %v702_v33 = vadd.f32 %v3480_v37, %v701_v3 }
 0x158   : > { %v524_v30 = vpack.c.bf16 %v492_v27, %v490_v24 }
 0x15c   : > { %v772_v34 = vpop.f32.mrf.mxu1  ;;  %v703_v16 = vpop.f32.mrf.mxu0 }
 0x15d   : > { %v773_v35 = vadd.f32 %v772_v34, %v684_v32  ;;  %v704_v34 = vadd.f32 %v3480_v37, %v703_v16  ;;  %v2727_v16 = vld [vmem:[%s4049_s5] sm:$0xff] }
 0x15e   : > { %2755 = vmatpush.bf16.msra.mxu3 %v2727_v16  ;;  %1181 = vmatpush.bf16.msrb.mxu1 %v2727_v16 }
 0x15f   : > { %v842_v39 = vmax.f32 %v773_v35, 0.0 }
 0x161   : > { %v870_v43 = vpack.c.bf16 %v842_v39, %v841_v38 }
 0x163   : > { %2504 = vmatmul.msk.bf16.vlgmr.msra.gmra.mxu2 %vm919_vm0, %v870_v43 }
 0x164   : > { %v775_v45 = vpop.f32.mrf.mxu1  ;;  %v706_v29 = vpop.f32.mrf.mxu0 }
 0x165   : > { %v776_v49 = vadd.f32 %v775_v45, %v687_v46  ;;  %v707_v46 = vadd.f32 %v3480_v37, %v706_v29 }
 0x167   : > { %814 = vmatmul.bf16.gmra.mxu1 %v518_v44  ;;  %v843_v52 = vmax.f32 %v776_v49, 0.0 }
 0x16c   : > { %v777_v50 = vpop.f32.mrf.mxu1  ;;  %v708_v39 = vpop.f32.mrf.mxu0 }
 0x16d   : > { %v778_v51 = vadd.f32 %v777_v50, %v689_v48  ;;  %v709_v47 = vadd.f32 %v3480_v37, %v708_v39 }
 0x16f   : > { %v844_v53 = vmax.f32 %v778_v51, 0.0 }
 0x171   : > { %v871_v56 = vpack.c.bf16 %v844_v53, %v843_v52 }
 0x173   : > { %2505 = vmatmul.msk.bf16.gmra.mxu2 %vm919_vm0, %v871_v56 }
 0x174   : > { %v780_v59 = vpop.f32.mrf.mxu1  ;;  %v711_v45 = vpop.f32.mrf.mxu0 }
 0x175   : > { %v781_v63 = vadd.f32 %v780_v59, %v692_v61  ;;  %v712_v56 = vadd.f32 %v3480_v37, %v711_v45 }
 0x177   : > { %819 = vmatmul.bf16.gmra.mxu1 %v520_v58  ;;  %v845_v4 = vmax.f32 %v781_v63, 0.0 }
 0x17c   : > { %v782_v0 = vpop.f32.mrf.mxu1  ;;  %v713_v53 = vpop.f32.mrf.mxu0 }
 0x17d   : > { %v783_v1 = vadd.f32 %v782_v0, %v694_v62 }
 0x17f   : > { %v846_v5 = vmax.f32 %v783_v1, 0.0 }
 0x181   : > { %v872_v11 = vpack.c.bf16 %v846_v5, %v845_v4 }
 0x183   : > { %2506 = vmatmul.msk.bf16.gmra.mxu2 %vm919_vm0, %v872_v11 }
 0x184   : > { %v785_v13 = vpop.f32.mrf.mxu1  ;;  %v716_v58 = vpop.f32.mrf.mxu0 }
 0x185   : > { %v786_v18 = vadd.f32 %v785_v13, %v697_v14  ;;  %v717_v4 = vadd.f32 %v3480_v37, %v716_v58 }
 0x187   : > { %824 = vmatmul.bf16.gmra.mxu1 %v522_v12  ;;  %v847_v22 = vmax.f32 %v786_v18, 0.0 }
 0x18c   : > { %v787_v19 = vpop.f32.mrf.mxu1  ;;  %v718_v1 = vpop.f32.mrf.mxu0 }
 0x18d   : > { %v788_v21 = vadd.f32 %v787_v19, %v699_v17  ;;  %v2730_v19 = vld [vmem:[%s4051_s7 + $0x8] sm:$0xff] }
 0x18e   : > { %1385 = vmatpush.bf16.msrb.mxu3 %v2730_v19  ;;  %v744_v19 = vadd.f32 %v3480_v37, %v3475_v36 }
 0x18f   : > { %v848_v23 = vmax.f32 %v788_v21, 0.0 }
 0x191   : > { %v873_v28 = vpack.c.bf16 %v848_v23, %v847_v22 }
 0x193   : > { %2507 = vmatmul.msk.bf16.gmra.mxu2 %vm919_vm0, %v873_v28 }
 0x194   : > { %v790_v32 = vpop.f32.mrf.mxu1  ;;  %v721_v12 = vpop.f32.mrf.mxu0 }
 0x195   : > { %v791_v35 = vadd.f32 %v790_v32, %v702_v33  ;;  %v722_v18 = vadd.f32 %v3480_v37, %v721_v12 }
 0x197   : > { %829 = vmatmul.bf16.gmra.mxu1 %v524_v30  ;;  %v849_v41 = vmax.f32 %v791_v35, 0.0  ;;  %v3562_v35 = vld [vmem:[%s4048_s4] ss:$0 sm:$0xff] }
 0x19c   : > { %v792_v38 = vpop.f32.mrf.mxu1  ;;  %v723_v21 = vpop.f32.mrf.mxu0 }
 0x19d   : > { %v793_v40 = vadd.f32 %v792_v38, %v704_v34  ;;  %v724_v22 = vadd.f32 %v3480_v37, %v723_v21  ;;  %v727_v34 = vadd.f32 %v3480_v37, %v3444_v2  ;;  %v729_v38 = vadd.f32 %v3480_v37, %v3448_v6 }
 0x19f   : > { %v850_v42 = vmax.f32 %v793_v40, 0.0 }
 0x1a1   : > { %v874_v43 = vpack.c.bf16 %v850_v42, %v849_v41 }
 0x1a3   : > { %2508 = vmatmul.msk.bf16.gmra.mxu2 %vm919_vm0, %v874_v43 }
 0x1a4   : > { %v795_v44 = vpop.f32.mrf.mxu1 }
 0x1a5   : > { %v796_v48 = vadd.f32 %v795_v44, %v707_v46 }
 0x1a7   : > { %2501 = vmatmul.msk.bf16.vlgmr.msra.gmra.mxu1 %vm919_vm0, %v3491_v57  ;;  %v851_v51 = vmax.f32 %v796_v48, 0.0  ;;  %v714_v57 = vadd.f32 %v3480_v37, %v713_v53 }
 0x1ac   : > { %v797_v49 = vpop.f32.mrf.mxu1 }
 0x1ad   : > { %v798_v50 = vadd.f32 %v797_v49, %v709_v47 }
 0x1af   : > { %v852_v52 = vmax.f32 %v798_v50, 0.0 }
 0x1b1   : > { %v875_v54 = vpack.c.bf16 %v852_v52, %v851_v51  ;;  %v732_v51 = vadd.f32 %v3480_v37, %v3452_v10  ;;  %v734_v52 = vadd.f32 %v3480_v37, %v3456_v15 }
 0x1b3   : > { %2509 = vmatmul.msk.bf16.gmra.mxu2 %vm919_vm0, %v875_v54 }
 0x1b4   : > { %v800_v55 = vpop.f32.mrf.mxu1 }
 0x1b5   : > { %v801_v59 = vadd.f32 %v800_v55, %v712_v56 }
 0x1b7   : > { %2502 = vmatmul.msk.bf16.gmra.mxu1 %vm919_vm0, %v3500_v9  ;;  %v853_v62 = vmax.f32 %v801_v59, 0.0  ;;  %v719_v9 = vadd.f32 %v3480_v37, %v718_v1  ;;  %v737_v1 = vadd.f32 %v3480_v37, %v3460_v20 }
 0x1bc   : > { %v802_v60 = vpop.f32.mrf.mxu1 }
 0x1bd   : > { %v803_v61 = vadd.f32 %v802_v60, %v714_v57 }
 0x1bf   : > { %v854_v63 = vmax.f32 %v803_v61, 0.0 }
 0x1c1   : > { %v876_v0 = vpack.c.bf16 %v854_v63, %v853_v62 }
 0x1c3   : > { %2510 = vmatmul.msk.bf16.gmra.mxu2 %vm919_vm0, %v876_v0 }
 0x1c4   : > { %v805_v3 = vpop.f32.mrf.mxu1 }
 0x1c5   : > { %v806_v5 = vadd.f32 %v805_v3, %v717_v4  ;;  %v739_v3 = vadd.f32 %v3480_v37, %v3464_v25 }
 0x1c7   : > { %2503 = vmatmul.msk.bf16.gmra.mxu1 %vm919_vm0, %v3505_v26  ;;  %v855_v13 = vmax.f32 %v806_v5, 0.0 }
 0x1cc   : > { %v807_v7 = vpop.f32.mrf.mxu1 }
 0x1cd   : > { %v808_v11 = vadd.f32 %v807_v7, %v719_v9 }
 0x1cf   : > { %v856_v14 = vmax.f32 %v808_v11, 0.0 }
 0x1d1   : > { %v877_v17 = vpack.c.bf16 %v856_v14, %v855_v13 }
 0x1d3   : > { %2511 = vmatmul.msk.bf16.gmra.mxu2 %vm919_vm0, %v877_v17 }
 0x1d4   : > { %v810_v26 = vpop.f32.mrf.mxu1 }
 0x1d5   : > { %v811_v23 = vadd.f32 %v810_v26, %v722_v18  ;;  %v742_v18 = vadd.f32 %v3480_v37, %v3471_v31 }
 0x1d7   : > { %v857_v28 = vmax.f32 %v811_v23, 0.0 }
 0x1dc   : > { %v812_v24 = vpop.f32.mrf.mxu1 }
 0x1dd   : > { %v813_v27 = vadd.f32 %v812_v24, %v724_v22 }
 0x1df   : > { %v858_v29 = vmax.f32 %v813_v27, 0.0 }
 0x1e1   : > { %v878_v30 = vpack.c.bf16 %v858_v29, %v857_v28 }
 0x1e3   : > { %2512 = vmatmul.msk.bf16.gmra.mxu2 %vm919_vm0, %v878_v30 }
 0x1e4   : > { %v815_v32 = vpop.f32.mrf.mxu1 }
 0x1e5   : > { %v816_v39 = vadd.f32 %v815_v32, %v727_v34 }
 0x1e6   : > { %v992_v33 = vpop.f32.mrf.mxu2 }
 0x1e7   : > { %v993_v41 = vadd.f32 %v3562_v35, %v992_v33  ;;  %v859_v44 = vmax.f32 %v816_v39, 0.0 }
 0x1e9   : > { %v1063_v47 = vmax.f32 %v993_v41, 0.0 }
 0x1ec   : > { %v817_v40 = vpop.f32.mrf.mxu1 }
 0x1ed   : > { %v818_v42 = vadd.f32 %v817_v40, %v729_v38 }
 0x1ee   : > { %v994_v43 = vpop.f32.mrf.mxu2 }
 0x1ef   : > { %v860_v45 = vmax.f32 %v818_v42, 0.0  ;;  %v995_v46 = vadd.f32 %v3562_v35, %v994_v43 }
 0x1f1   : > { %v879_v2 = vpack.c.bf16 %v860_v45, %v859_v44  ;;  %v1064_v48 = vmax.f32 %v995_v46, 0.0 }
 0x1f3   : > { %2513 = vmatmul.msk.bf16.gmra.mxu2 %vm919_vm0, %v879_v2  ;;  %v1092_v49 = vpack.c.bf16 %v1064_v48, %v1063_v47 }
 0x1f4   : > { %v820_v50 = vpop.f32.mrf.mxu1 }
 0x1f5   : > { %2528 = vmatmul.msk.bf16.vlgmr.msra.gmra.mxu3 %vm1125_vm1, %v1092_v49  ;;  %v821_v53 = vadd.f32 %v820_v50, %v732_v51 }
 0x1f6   : > { %v997_v6 = vpop.f32.mrf.mxu2 }
 0x1f7   : > { %v998_v55 = vadd.f32 %v3562_v35, %v997_v6  ;;  %v861_v57 = vmax.f32 %v821_v53, 0.0  ;;  %v2729_v6 = vld [vmem:[%s4051_s7] sm:$0xff] }
 0x1f8   : > { %1386 = vmatpush.bf16.msrb.mxu3 %v2729_v6 }
 0x1f9   : > { %v1065_v61 = vmax.f32 %v998_v55, 0.0 }
 0x1fc   : > { %v822_v54 = vpop.f32.mrf.mxu1 }
 0x1fd   : > { %v823_v56 = vadd.f32 %v822_v54, %v734_v52 }
 0x1fe   : > { %v999_v58 = vpop.f32.mrf.mxu2 }
 0x1ff   : > { %v862_v59 = vmax.f32 %v823_v56, 0.0  ;;  %v1000_v60 = vadd.f32 %v3562_v35, %v999_v58 }
 0x201   : > { %v880_v62 = vpack.c.bf16 %v862_v59, %v861_v57  ;;  %v1066_v63 = vmax.f32 %v1000_v60, 0.0 }
 0x203   : > { %2514 = vmatmul.msk.bf16.gmra.mxu2 %vm919_vm0, %v880_v62  ;;  %v1093_v0 = vpack.c.bf16 %v1066_v63, %v1065_v61 }
 0x204   : > { %v825_v10 = vpop.f32.mrf.mxu1 }
 0x205   : > { %2529 = vmatmul.msk.bf16.gmra.mxu3 %vm1125_vm1, %v1093_v0  ;;  %v826_v4 = vadd.f32 %v825_v10, %v737_v1 }
 0x206   : > { %v1002_v15 = vpop.f32.mrf.mxu2 }
 0x207   : > { %v1003_v5 = vadd.f32 %v3562_v35, %v1002_v15  ;;  %v863_v11 = vmax.f32 %v826_v4, 0.0 }
 0x209   : > { %v1067_v14 = vmax.f32 %v1003_v5, 0.0 }
 0x20c   : > { %v827_v9 = vpop.f32.mrf.mxu1 }
 0x20d   : > { %v828_v7 = vadd.f32 %v827_v9, %v739_v3 }
 0x20e   : > { %v1004_v8 = vpop.f32.mrf.mxu2 }
 0x20f   : > { %v864_v12 = vmax.f32 %v828_v7, 0.0  ;;  %v1005_v13 = vadd.f32 %v3562_v35, %v1004_v8 }
 0x211   : > { %v881_v16 = vpack.c.bf16 %v864_v12, %v863_v11  ;;  %v1068_v17 = vmax.f32 %v1005_v13, 0.0 }
 0x213   : > { %2515 = vmatmul.msk.bf16.gmra.mxu2 %vm919_vm0, %v881_v16  ;;  %v1094_v26 = vpack.c.bf16 %v1068_v17, %v1067_v14 }
 0x214   : > { %v830_v20 = vpop.f32.mrf.mxu1 }
 0x215   : > { %2530 = vmatmul.msk.bf16.gmra.mxu3 %vm1125_vm1, %v1094_v26  ;;  %v831_v21 = vadd.f32 %v830_v20, %v742_v18 }
 0x216   : > { %v1007_v25 = vpop.f32.mrf.mxu2 }
 0x217   : > { %v1008_v23 = vadd.f32 %v3562_v35, %v1007_v25  ;;  %v865_v28 = vmax.f32 %v831_v21, 0.0  ;;  %v2591_v21 = vld [vmem:[%s4053_s9 + $0x30] sm:$0xf] }
 0x219   : > { %v1069_v32 = vmax.f32 %v1008_v23, 0.0 }
 0x21c   : > { %v832_v22 = vpop.f32.mrf.mxu1 }
 0x21d   : > { %v833_v24 = vadd.f32 %v832_v22, %v744_v19  ;;  %v2738_v22 = vld [vmem:[%s4053_s9 + $0x34] sm:$0xf0] }
 0x21e   : > { %v1009_v27 = vpop.f32.mrf.mxu2  ;;  %v2592_v23 = vor.u32 %v2738_v22, %v2591_v21 }
 0x21f   : > { %v866_v29 = vmax.f32 %v833_v24, 0.0  ;;  %v1010_v30 = vadd.f32 %v3562_v35, %v1009_v27 }
 0x220   : > { %1622 = vmatpush.bf16.msrb.mxu2 %v2592_v23 }
 0x221   : > { %v882_v33 = vpack.c.bf16 %v866_v29, %v865_v28  ;;  %v1070_v34 = vmax.f32 %v1010_v30, 0.0 }
 0x223   : > { %2516 = vmatmul.msk.bf16.gmra.mxu2 %vm919_vm0, %v882_v33  ;;  %v1095_v38 = vpack.c.bf16 %v1070_v34, %v1069_v32 }
 0x224   : > { %v977_v31 = vpop.f32.mrf.mxu1 }
 0x225   : > { %2531 = vmatmul.msk.bf16.gmra.mxu3 %vm1125_vm1, %v1095_v38  ;;  %v978_v37 = vadd.f32 %v3562_v35, %v977_v31  ;;  %v3630_v38 = vld [vmem:[%s4050_s6] ss:$0 sm:$0xff]  ;;  %v2737_v31 = vld [vmem:[%s4053_s9 + $0x34] sm:$0xf] }
 0x226   : > { %v1012_v36 = vpop.f32.mrf.mxu2 }
 0x227   : > { %v1013_v40 = vadd.f32 %v3562_v35, %v1012_v36  ;;  %v1057_v43 = vmax.f32 %v978_v37, 0.0  ;;  %v2593_v36 = vld [vmem:[%s4053_s9 + $0x38] sm:$0xf0] }
 0x228   : > { %v2596_v37 = vor.u32 %v2737_v31, %v2593_v36 }
 0x229   : > { %v1071_v46 = vmax.f32 %v1013_v40, 0.0 }
 0x22a   : > { %1711 = vmatpush.bf16.msrb.mxu0 %v2596_v37 }
 0x22c   : > { %v979_v39 = vpop.f32.mrf.mxu1 }
 0x22d   : > { %v980_v41 = vadd.f32 %v3562_v35, %v979_v39 }
 0x22e   : > { %v1014_v42 = vpop.f32.mrf.mxu2 }
 0x22f   : > { %v1058_v44 = vmax.f32 %v980_v41, 0.0  ;;  %v1015_v45 = vadd.f32 %v3562_v35, %v1014_v42 }
 0x231   : > { %v1089_v47 = vpack.c.bf16 %v1058_v44, %v1057_v43  ;;  %v1072_v2 = vmax.f32 %v1015_v45, 0.0 }
 0x233   : > { %2525 = vmatmul.msk.bf16.vlgmr.msrb.gmra.mxu1 %vm1125_vm1, %v1089_v47  ;;  %v1096_v48 = vpack.c.bf16 %v1072_v2, %v1071_v46 }
 0x234   : > { %v982_v49 = vpop.f32.mrf.mxu1 }
 0x235   : > { %2532 = vmatmul.msk.bf16.gmra.mxu3 %vm1125_vm1, %v1096_v48  ;;  %v983_v51 = vadd.f32 %v3562_v35, %v982_v49 }
 0x236   : > { %v1017_v50 = vpop.f32.mrf.mxu2 }
 0x237   : > { %v1018_v53 = vadd.f32 %v3562_v35, %v1017_v50  ;;  %v1059_v56 = vmax.f32 %v983_v51, 0.0 }
 0x239   : > { %v1073_v59 = vmax.f32 %v1018_v53, 0.0 }
 0x23c   : > { %v984_v52 = vpop.f32.mrf.mxu1 }
 0x23d   : > { %v985_v54 = vadd.f32 %v3562_v35, %v984_v52 }
 0x23e   : > { %v1019_v55 = vpop.f32.mrf.mxu2 }
 0x23f   : > { %v1060_v58 = vmax.f32 %v985_v54, 0.0  ;;  %v1020_v57 = vadd.f32 %v3562_v35, %v1019_v55 }
 0x241   : > { %v1090_v60 = vpack.c.bf16 %v1060_v58, %v1059_v56  ;;  %v1074_v61 = vmax.f32 %v1020_v57, 0.0 }
 0x243   : > { %2526 = vmatmul.msk.bf16.gmra.mxu1 %vm1125_vm1, %v1090_v60  ;;  %v1097_v62 = vpack.c.bf16 %v1074_v61, %v1073_v59 }
 0x244   : > { %v987_v63 = vpop.f32.mrf.mxu1 }
 0x245   : > { %2533 = vmatmul.msk.bf16.gmra.mxu3 %vm1125_vm1, %v1097_v62  ;;  %v988_v10 = vadd.f32 %v3562_v35, %v987_v63 }
 0x246   : > { %v1022_v0 = vpop.f32.mrf.mxu2 }
 0x247   : > { %v1023_v1 = vadd.f32 %v3562_v35, %v1022_v0  ;;  %v1061_v9 = vmax.f32 %v988_v10, 0.0 }
 0x249   : > { %v1075_v8 = vmax.f32 %v1023_v1, 0.0  ;;  %v2736_v1 = vld [vmem:[%s4053_s9 + $0x24] sm:$0xf0] }
 0x24c   : > { %v989_v15 = vpop.f32.mrf.mxu1 }
 0x24d   : > { %v990_v3 = vadd.f32 %v3562_v35, %v989_v15  ;;  %v2583_v15 = vld [vmem:[%s4053_s9 + $0x20] sm:$0xf] }
 0x24e   : > { %v1024_v4 = vpop.f32.mrf.mxu2 }
 0x24f   : > { %v1062_v5 = vmax.f32 %v990_v3, 0.0  ;;  %v1025_v7 = vadd.f32 %v3562_v35, %v1024_v4  ;;  %v2584_v4 = vor.u32 %v2736_v1, %v2583_v15 }
 0x251   : > { %v1091_v11 = vpack.c.bf16 %v1062_v5, %v1061_v9  ;;  %v1076_v12 = vmax.f32 %v1025_v7, 0.0  ;;  %1623 = vmatpush.bf16.msrb.mxu2 %v2584_v4 }
 0x253   : > { %2527 = vmatmul.msk.bf16.gmra.mxu1 %vm1125_vm1, %v1091_v11  ;;  %v1098_v13 = vpack.c.bf16 %v1076_v12, %v1075_v8 }
 0x255   : > { %2534 = vmatmul.msk.bf16.gmra.mxu3 %vm1125_vm1, %v1098_v13 }
 0x256   : > { %v1027_v14 = vpop.f32.mrf.mxu2 }
 0x257   : > { %v1028_v16 = vadd.f32 %v3562_v35, %v1027_v14 }
 0x259   : > { %v1077_v20 = vmax.f32 %v1028_v16, 0.0 }
 0x25e   : > { %v1029_v17 = vpop.f32.mrf.mxu2 }
 0x25f   : > { %v1030_v26 = vadd.f32 %v3562_v35, %v1029_v17 }
 0x261   : > { %v1078_v25 = vmax.f32 %v1030_v26, 0.0 }
 0x263   : > { %v1099_v18 = vpack.c.bf16 %v1078_v25, %v1077_v20 }
 0x265   : > { %2535 = vmatmul.msk.bf16.gmra.mxu3 %vm1125_vm1, %v1099_v18  ;;  %v2735_v18 = vld [vmem:[%s4053_s9 + $0x24] sm:$0xf] }
 0x266   : > { %v1032_v19 = vpop.f32.mrf.mxu2 }
 0x267   : > { %v1033_v24 = vadd.f32 %v3562_v35, %v1032_v19  ;;  %v2585_v19 = vld [vmem:[%s4053_s9 + $0x28] sm:$0xf0] }
 0x268   : > { %v2588_v22 = vor.u32 %v2735_v18, %v2585_v19 }
 0x269   : > { %v1079_v29 = vmax.f32 %v1033_v24, 0.0 }
 0x26a   : > { %1712 = vmatpush.bf16.msrb.mxu0 %v2588_v22 }
 0x26e   : > { %v1034_v27 = vpop.f32.mrf.mxu2 }
 0x26f   : > { %v1035_v28 = vadd.f32 %v3562_v35, %v1034_v27 }
 0x271   : > { %v1080_v30 = vmax.f32 %v1035_v28, 0.0 }
 0x273   : > { %v1100_v32 = vpack.c.bf16 %v1080_v30, %v1079_v29 }
 0x275   : > { %2536 = vmatmul.msk.bf16.gmra.mxu3 %vm1125_vm1, %v1100_v32 }
 0x276   : > { %v1037_v33 = vpop.f32.mrf.mxu2 }
 0x277   : > { %v1038_v39 = vadd.f32 %v3562_v35, %v1037_v33 }
 0x278   : > { %v1198_v34 = vpop.f32.mrf.mxu3 }
 0x279   : > { %v1199_v41 = vadd.f32 %v3630_v38, %v1198_v34  ;;  %v1081_v44 = vmax.f32 %v1038_v39, 0.0 }
 0x27b   : > { %v1269_v47 = vmax.f32 %v1199_v41, 0.0 }
 0x27e   : > { %v1039_v40 = vpop.f32.mrf.mxu2 }
 0x27f   : > { %v1040_v42 = vadd.f32 %v3562_v35, %v1039_v40 }
 0x280   : > { %v1200_v43 = vpop.f32.mrf.mxu3 }
 0x281   : > { %v1082_v45 = vmax.f32 %v1040_v42, 0.0  ;;  %v1201_v46 = vadd.f32 %v3630_v38, %v1200_v43 }
 0x283   : > { %v1270_v2 = vmax.f32 %v1201_v46, 0.0  ;;  %v1101_v48 = vpack.c.bf16 %v1082_v45, %v1081_v44 }
 0x285   : > { %v3642_v49 = vpack.c.bf16 %v1270_v2, %v1269_v47  ;;  %2537 = vmatmul.msk.bf16.gmra.mxu3 %vm1125_vm1, %v1101_v48 }
 0x286   : > { %v1042_v50 = vpop.f32.mrf.mxu2 }
 0x287   : > { %v1043_v51 = vadd.f32 %v3562_v35, %v1042_v50 }
 0x288   : > { %v1203_v6 = vpop.f32.mrf.mxu3 }
 0x289   : > { %v1204_v53 = vadd.f32 %v3630_v38, %v1203_v6  ;;  %v1083_v56 = vmax.f32 %v1043_v51, 0.0 }
 0x28b   : > { %v1271_v59 = vmax.f32 %v1204_v53, 0.0  ;;  %v2575_v53 = vld [vmem:[%s4053_s9 + $0x10] sm:$0xf] }
 0x28e   : > { %v1044_v52 = vpop.f32.mrf.mxu2 }
 0x28f   : > { %v1045_v54 = vadd.f32 %v3562_v35, %v1044_v52 }
 0x290   : > { %v1205_v55 = vpop.f32.mrf.mxu3 }
 0x291   : > { %v1084_v58 = vmax.f32 %v1045_v54, 0.0  ;;  %v1206_v57 = vadd.f32 %v3630_v38, %v1205_v55  ;;  %v2734_v54 = vld [vmem:[%s4053_s9 + $0x14] sm:$0xf0] }
 0x292   : > { %v2576_v55 = vor.u32 %v2734_v54, %v2575_v53 }
 0x293   : > { %v1272_v60 = vmax.f32 %v1206_v57, 0.0  ;;  %v1102_v61 = vpack.c.bf16 %v1084_v58, %v1083_v56 }
 0x294   : > { %1624 = vmatpush.bf16.msrb.mxu2 %v2576_v55 }
 0x295   : > { %v3649_v62 = vpack.c.bf16 %v1272_v60, %v1271_v59  ;;  %2538 = vmatmul.msk.bf16.gmra.mxu3 %vm1125_vm1, %v1102_v61 }
 0x296   : > { %v1047_v63 = vpop.f32.mrf.mxu2 }
 0x297   : > { %v1048_v10 = vadd.f32 %v3562_v35, %v1047_v63 }
 0x298   : > { %v1208_v0 = vpop.f32.mrf.mxu3 }
 0x299   : > { %v1209_v9 = vadd.f32 %v3630_v38, %v1208_v0  ;;  %v1085_v8 = vmax.f32 %v1048_v10, 0.0 }
 0x29b   : > { %v1273_v13 = vmax.f32 %v1209_v9, 0.0 }
 0x29e   : > { %v1049_v3 = vpop.f32.mrf.mxu2 }
 0x29f   : > { %v1050_v5 = vadd.f32 %v3562_v35, %v1049_v3 }
 0x2a0   : > { %v1210_v7 = vpop.f32.mrf.mxu3 }
 0x2a1   : > { %v1086_v11 = vmax.f32 %v1050_v5, 0.0  ;;  %v1211_v12 = vadd.f32 %v3630_v38, %v1210_v7  ;;  %v2733_v5 = vld [vmem:[%s4053_s9 + $0x14] sm:$0xf]  ;;  %v2577_v7 = vld [vmem:[%s4053_s9 + $0x18] sm:$0xf0] }
 0x2a3   : > { %v1274_v14 = vmax.f32 %v1211_v12, 0.0  ;;  %v1103_v16 = vpack.c.bf16 %v1086_v11, %v1085_v8  ;;  %v2580_v8 = vor.u32 %v2733_v5, %v2577_v7  ;;  %v3762_v7 = vld [vmem:[%s4052_s8] ss:$0 sm:$0xff] }
 0x2a5   : > { %v3662_v17 = vpack.c.bf16 %v1274_v14, %v1273_v13  ;;  %2539 = vmatmul.msk.bf16.gmra.mxu3 %vm1125_vm1, %v1103_v16  ;;  %1713 = vmatpush.bf16.msrb.mxu0 %v2580_v8 }
 0x2a6   : > { %v1052_v26 = vpop.f32.mrf.mxu2 }
 0x2a7   : > { %v1053_v25 = vadd.f32 %v3562_v35, %v1052_v26 }
 0x2a8   : > { %v1213_v20 = vpop.f32.mrf.mxu3 }
 0x2a9   : > { %v1214_v23 = vadd.f32 %v3630_v38, %v1213_v20  ;;  %v1087_v29 = vmax.f32 %v1053_v25, 0.0 }
 0x2ab   : > { %v1275_v33 = vmax.f32 %v1214_v23, 0.0 }
 0x2ae   : > { %v1054_v21 = vpop.f32.mrf.mxu2 }
 0x2af   : > { %v1055_v24 = vadd.f32 %v3562_v35, %v1054_v21 }
 0x2b0   : > { %v1183_v27 = vpop.f32.mrf.mxu1  ;;  %v1215_v28 = vpop.f32.mrf.mxu3 }
 0x2b1   : > { %v1088_v30 = vmax.f32 %v1055_v24, 0.0  ;;  %v1216_v32 = vadd.f32 %v3630_v38, %v1215_v28  ;;  %v1184_v35 = vadd.f32 %v3630_v38, %v1183_v27 }
 0x2b3   : > { %v1104_v34 = vpack.c.bf16 %v1088_v30, %v1087_v29  ;;  %v1276_v31 = vmax.f32 %v1216_v32, 0.0  ;;  %v1263_v45 = vmax.f32 %v1184_v35, 0.0 }
 0x2b5   : > { %v3675_v36 = vpack.c.bf16 %v1276_v31, %v1275_v33  ;;  %2540 = vmatmul.msk.bf16.gmra.mxu3 %vm1125_vm1, %v1104_v34 }
 0x2b8   : > { %v1185_v37 = vpop.f32.mrf.mxu1  ;;  %v1218_v39 = vpop.f32.mrf.mxu3 }
 0x2b9   : > { %v1186_v40 = vadd.f32 %v3630_v38, %v1185_v37  ;;  %v1219_v42 = vadd.f32 %v3630_v38, %v1218_v39 }
 0x2bb   : > { %v1264_v41 = vmax.f32 %v1186_v40, 0.0  ;;  %v1277_v2 = vmax.f32 %v1219_v42, 0.0  ;;  %v2567_v40 = vld [vmem:[%s4053_s9] sm:$0xf]  ;;  %v2731_v42 = vld [vmem:[%s4053_s9 + $0x4] sm:$0xf] }
 0x2bd   : > { %v1295_v47 = vpack.c.bf16 %v1264_v41, %v1263_v45 }
 0x2c0   : > { %v1188_v43 = vpop.f32.mrf.mxu1  ;;  %v1220_v44 = vpop.f32.mrf.mxu3 }
 0x2c1   : > { %v1221_v46 = vadd.f32 %v3630_v38, %v1220_v44  ;;  %v1189_v56 = vadd.f32 %v3630_v38, %v1188_v43  ;;  %v2569_v43 = vld [vmem:[%s4053_s9 + $0x8] sm:$0xf0] }
 0x2c3   : > { %v1278_v48 = vmax.f32 %v1221_v46, 0.0  ;;  %v1265_v61 = vmax.f32 %v1189_v56, 0.0 }
 0x2c5   : > { %v3682_v50 = vpack.c.bf16 %v1278_v48, %v1277_v2  ;;  %2549 = vmatmul.msk.bf16.vlgmr.msrb.gmra.mxu3 %vm1125_vm1, %v1295_v47 }
 0x2c8   : > { %v1190_v6 = vpop.f32.mrf.mxu1  ;;  %v1223_v51 = vpop.f32.mrf.mxu3 }
 0x2c9   : > { %v1191_v52 = vadd.f32 %v3630_v38, %v1190_v6  ;;  %v1224_v57 = vadd.f32 %v3630_v38, %v1223_v51 }
 0x2cb   : > { %v1266_v58 = vmax.f32 %v1191_v52, 0.0  ;;  %v1279_v10 = vmax.f32 %v1224_v57, 0.0 }
 0x2cd   : > { %v1296_v0 = vpack.c.bf16 %v1266_v58, %v1265_v61 }
 0x2d0   : > { %v1193_v59 = vpop.f32.mrf.mxu1  ;;  %v1225_v60 = vpop.f32.mrf.mxu3 }
 0x2d1   : > { %v1226_v63 = vadd.f32 %v3630_v38, %v1225_v60  ;;  %v1194_v11 = vadd.f32 %v3630_v38, %v1193_v59 }
 0x2d3   : > { %v1280_v15 = vmax.f32 %v1226_v63, 0.0  ;;  %v1267_v16 = vmax.f32 %v1194_v11, 0.0 }
 0x2d5   : > { %v3695_v1 = vpack.c.bf16 %v1280_v15, %v1279_v10  ;;  %2550 = vmatmul.msk.bf16.gmra.mxu3 %vm1125_vm1, %v1296_v0 }
 0x2d8   : > { %v1195_v3 = vpop.f32.mrf.mxu1  ;;  %v1228_v4 = vpop.f32.mrf.mxu3 }
 0x2d9   : > { %v1196_v9 = vadd.f32 %v3630_v38, %v1195_v3  ;;  %v1229_v13 = vadd.f32 %v3630_v38, %v1228_v4 }
 0x2db   : > { %v1268_v12 = vmax.f32 %v1196_v9, 0.0  ;;  %v1281_v25 = vmax.f32 %v1229_v13, 0.0 }
 0x2dd   : > { %v1297_v20 = vpack.c.bf16 %v1268_v12, %v1267_v16 }
 0x2e0   : > { %v1230_v14 = vpop.f32.mrf.mxu3 }
 0x2e1   : > { %v1231_v26 = vadd.f32 %v3630_v38, %v1230_v14 }
 0x2e3   : > { %v1282_v18 = vmax.f32 %v1231_v26, 0.0 }
 0x2e5   : > { %v3708_v19 = vpack.c.bf16 %v1282_v18, %v1281_v25  ;;  %2551 = vmatmul.msk.bf16.gmra.mxu3 %vm1125_vm1, %v1297_v20 }
 0x2e8   : > { %v1233_v21 = vpop.f32.mrf.mxu3 }
 0x2e9   : > { %v1234_v22 = vadd.f32 %v3630_v38, %v1233_v21 }
 0x2eb   : > { %v1283_v27 = vmax.f32 %v1234_v22, 0.0 }
 0x2f0   : > { %v1235_v23 = vpop.f32.mrf.mxu3 }
 0x2f1   : > { %v1236_v24 = vadd.f32 %v3630_v38, %v1235_v23 }
 0x2f3   : > { %v1284_v28 = vmax.f32 %v1236_v24, 0.0 }
 0x2f5   : > { %v3713_v29 = vpack.c.bf16 %v1284_v28, %v1283_v27  ;;  %2552 = vmatmul.msk.bf16.gmra.mxu3 %vm1125_vm1, %v3642_v49  ;;  %v2732_v49 = vld [vmem:[%s4053_s9 + $0x4] sm:$0xf0] }
 0x2f6   : > { %v2568_v35 = vor.u32 %v2732_v49, %v2567_v40 }
 0x2f8   : > { %v1238_v30 = vpop.f32.mrf.mxu3  ;;  %1625 = vmatpush.bf16.msrb.mxu2 %v2568_v35 }
 0x2f9   : > { %v1239_v32 = vadd.f32 %v3630_v38, %v1238_v30 }
 0x2fb   : > { %v1285_v31 = vmax.f32 %v1239_v32, 0.0 }
 0x300   : > { %v1240_v33 = vpop.f32.mrf.mxu3 }
 0x301   : > { %v1241_v34 = vadd.f32 %v3630_v38, %v1240_v33 }
 0x303   : > { %v1286_v37 = vmax.f32 %v1241_v34, 0.0 }
 0x305   : > { %v3719_v39 = vpack.c.bf16 %v1286_v37, %v1285_v31  ;;  %2553 = vmatmul.msk.bf16.gmra.mxu3 %vm1125_vm1, %v3649_v62  ;;  %v2572_v62 = vor.u32 %v2731_v42, %v2569_v43 }
 0x307   : > { %1714 = vmatpush.bf16.msrb.mxu0 %v2572_v62 }
 0x308   : > { %v1243_v41 = vpop.f32.mrf.mxu3 }
 0x309   : > { %v1244_v44 = vadd.f32 %v3630_v38, %v1243_v41 }
 0x30b   : > { %v1287_v47 = vmax.f32 %v1244_v44, 0.0 }
 0x310   : > { %v1245_v45 = vpop.f32.mrf.mxu3 }
 0x311   : > { %v1246_v46 = vadd.f32 %v3630_v38, %v1245_v45 }
 0x313   : > { %v1288_v2 = vmax.f32 %v1246_v46, 0.0 }
 0x315   : > { %v3737_v48 = vpack.c.bf16 %v1288_v2, %v1287_v47  ;;  %2554 = vmatmul.msk.bf16.gmra.mxu3 %vm1125_vm1, %v3662_v17 }
 0x318   : > { %v1248_v6 = vpop.f32.mrf.mxu3 }
 0x319   : > { %v1249_v51 = vadd.f32 %v3630_v38, %v1248_v6 }
 0x31b   : > { %v1289_v54 = vmax.f32 %v1249_v51, 0.0 }
 0x320   : > { %v1250_v52 = vpop.f32.mrf.mxu3 }
 0x321   : > { %v1251_v53 = vadd.f32 %v3630_v38, %v1250_v52 }
 0x323   : > { %v1290_v55 = vmax.f32 %v1251_v53, 0.0 }
 0x325   : > { %v3743_v56 = vpack.c.bf16 %v1290_v55, %v1289_v54  ;;  %2555 = vmatmul.msk.bf16.gmra.mxu3 %vm1125_vm1, %v3675_v36 }
 0x328   : > { %v1253_v58 = vpop.f32.mrf.mxu3 }
 0x329   : > { %v1254_v57 = vadd.f32 %v3630_v38, %v1253_v58 }
 0x32b   : > { %v1291_v17 = vmax.f32 %v1254_v57, 0.0 }
 0x330   : > { %v1255_v59 = vpop.f32.mrf.mxu3 }
 0x331   : > { %v1256_v60 = vadd.f32 %v3630_v38, %v1255_v59 }
 0x333   : > { %v1292_v61 = vmax.f32 %v1256_v60, 0.0 }
 0x335   : > { %v3749_v63 = vpack.c.bf16 %v1292_v61, %v1291_v17  ;;  %2556 = vmatmul.msk.bf16.gmra.mxu3 %vm1125_vm1, %v3682_v50 }
 0x338   : > { %v1258_v0 = vpop.f32.mrf.mxu3 }
 0x339   : > { %v1259_v10 = vadd.f32 %v3630_v38, %v1258_v0 }
 0x33b   : > { %v1293_v36 = vmax.f32 %v1259_v10, 0.0  ;;  %v1524_v10 = vld [vmem:[%s4054_s10] sm:$0x3] }
 0x340   : > { %v1260_v15 = vpop.f32.mrf.mxu3 }
 0x341   : > { %v1261_v3 = vadd.f32 %v3630_v38, %v1260_v15 }
 0x343   : > { %v1294_v4 = vmax.f32 %v1261_v3, 0.0 }
 0x345   : > { %v3755_v9 = vpack.c.bf16 %v1294_v4, %v1293_v36  ;;  %2557 = vmatmul.msk.bf16.gmra.mxu3 %vm1125_vm1, %v3695_v1  ;;  %v3815_v4 = vperm.slane %v1524_v10, 1 }
 0x348   : > { %v1388_v5 = vpop.f32.mrf.mxu3 }
 0x349   : > { %v1389_v50 = vadd.f32 %v3762_v7, %v1388_v5 }
 0x34b   : > { %v1468_v12 = vmax.f32 %v1389_v50, 0.0 }
 0x350   : > { %v1390_v8 = vpop.f32.mrf.mxu3 }
 0x351   : > { %v1391_v11 = vadd.f32 %v3762_v7, %v1390_v8 }
 0x353   : > { %v1469_v38 = vmax.f32 %v1391_v11, 0.0 }
 0x355   : > { %v1500_v13 = vpack.c.bf16 %v1469_v38, %v1468_v12  ;;  %2558 = vmatmul.msk.bf16.gmra.mxu3 %vm1125_vm1, %v3708_v19  ;;  %v3820_v38 = vperm.slane %v1524_v10, 0 }
 0x357   : > { %2597 = vmatmul.msk.bf16.vlgmr.msrb.gmra.mxu2 %vm919_vm0, %v1500_v13  ;;  %2613 = vmatmul.msk.bf16.vlgmr.msrb.gmra.mxu0 %vm919_vm0, %v1500_v13 }
 0x358   : > { %v1393_v1 = vpop.f32.mrf.mxu3 }
 0x359   : > { %v1394_v14 = vadd.f32 %v3762_v7, %v1393_v1 }
 0x35b   : > { %v1470_v20 = vmax.f32 %v1394_v14, 0.0 }
 0x360   : > { %v1395_v16 = vpop.f32.mrf.mxu3 }
 0x361   : > { %v1396_v26 = vadd.f32 %v3762_v7, %v1395_v16 }
 0x363   : > { %v1471_v25 = vmax.f32 %v1396_v26, 0.0 }
 0x365   : > { %v1501_v18 = vpack.c.bf16 %v1471_v25, %v1470_v20  ;;  %2559 = vmatmul.msk.bf16.gmra.mxu3 %vm1125_vm1, %v3713_v29 }
 0x367   : > { %2598 = vmatmul.msk.bf16.gmra.mxu2 %vm919_vm0, %v1501_v18  ;;  %2614 = vmatmul.msk.bf16.gmra.mxu0 %vm919_vm0, %v1501_v18 }
 0x368   : > { %v1398_v19 = vpop.f32.mrf.mxu3 }
 0x369   : > { %v1399_v21 = vadd.f32 %v3762_v7, %v1398_v19 }
 0x36b   : > { %v1472_v24 = vmax.f32 %v1399_v21, 0.0 }
 0x370   : > { %v1400_v22 = vpop.f32.mrf.mxu3 }
 0x371   : > { %v1401_v23 = vadd.f32 %v3762_v7, %v1400_v22 }
 0x373   : > { %v1473_v27 = vmax.f32 %v1401_v23, 0.0 }
 0x375   : > { %v1502_v28 = vpack.c.bf16 %v1473_v27, %v1472_v24  ;;  %2560 = vmatmul.msk.bf16.gmra.mxu3 %vm1125_vm1, %v3719_v39 }
 0x377   : > { %2599 = vmatmul.msk.bf16.gmra.mxu2 %vm919_vm0, %v1502_v28  ;;  %2615 = vmatmul.msk.bf16.gmra.mxu0 %vm919_vm0, %v1502_v28 }
 0x378   : > { %v1403_v29 = vpop.f32.mrf.mxu3 }
 0x379   : > { %v1404_v30 = vadd.f32 %v3762_v7, %v1403_v29 }
 0x37b   : > { %v1474_v34 = vmax.f32 %v1404_v30, 0.0 }
 0x380   : > { %v1405_v32 = vpop.f32.mrf.mxu3 }
 0x381   : > { %v1406_v33 = vadd.f32 %v3762_v7, %v1405_v32 }
 0x383   : > { %v1475_v31 = vmax.f32 %v1406_v33, 0.0 }
 0x385   : > { %v1503_v37 = vpack.c.bf16 %v1475_v31, %v1474_v34  ;;  %2561 = vmatmul.msk.bf16.gmra.mxu3 %vm1125_vm1, %v3737_v48 }
 0x387   : > { %2600 = vmatmul.msk.bf16.gmra.mxu2 %vm919_vm0, %v1503_v37  ;;  %2616 = vmatmul.msk.bf16.gmra.mxu0 %vm919_vm0, %v1503_v37 }
 0x388   : > { %v1408_v39 = vpop.f32.mrf.mxu3 }
 0x389   : > { %v1409_v40 = vadd.f32 %v3762_v7, %v1408_v39 }
 0x38b   : > { %v1476_v41 = vmax.f32 %v1409_v40, 0.0 }
 0x390   : > { %v1410_v49 = vpop.f32.mrf.mxu3 }
 0x391   : > { %v1411_v35 = vadd.f32 %v3762_v7, %v1410_v49 }
 0x393   : > { %v1477_v42 = vmax.f32 %v1411_v35, 0.0 }
 0x395   : > { %v1504_v43 = vpack.c.bf16 %v1477_v42, %v1476_v41  ;;  %2562 = vmatmul.msk.bf16.gmra.mxu3 %vm1125_vm1, %v3743_v56 }
 0x397   : > { %2601 = vmatmul.msk.bf16.gmra.mxu2 %vm919_vm0, %v1504_v43  ;;  %2617 = vmatmul.msk.bf16.gmra.mxu0 %vm919_vm0, %v1504_v43 }
 0x398   : > { %v1413_v62 = vpop.f32.mrf.mxu3 }
 0x399   : > { %v1414_v44 = vadd.f32 %v3762_v7, %v1413_v62 }
 0x39b   : > { %v1478_v47 = vmax.f32 %v1414_v44, 0.0 }
 0x3a0   : > { %v1415_v45 = vpop.f32.mrf.mxu3 }
 0x3a1   : > { %v1416_v46 = vadd.f32 %v3762_v7, %v1415_v45 }
 0x3a3   : > { %v1479_v2 = vmax.f32 %v1416_v46, 0.0 }
 0x3a5   : > { %v1505_v48 = vpack.c.bf16 %v1479_v2, %v1478_v47  ;;  %2563 = vmatmul.msk.bf16.gmra.mxu3 %vm1125_vm1, %v3749_v63 }
 0x3a7   : > { %2602 = vmatmul.msk.bf16.gmra.mxu2 %vm919_vm0, %v1505_v48  ;;  %2618 = vmatmul.msk.bf16.gmra.mxu0 %vm919_vm0, %v1505_v48 }
 0x3a8   : > { %v1418_v6 = vpop.f32.mrf.mxu3 }
 0x3a9   : > { %v1419_v51 = vadd.f32 %v3762_v7, %v1418_v6 }
 0x3ab   : > { %v1480_v54 = vmax.f32 %v1419_v51, 0.0 }
 0x3b0   : > { %v1420_v52 = vpop.f32.mrf.mxu3 }
 0x3b1   : > { %v1421_v53 = vadd.f32 %v3762_v7, %v1420_v52 }
 0x3b3   : > { %v1481_v55 = vmax.f32 %v1421_v53, 0.0 }
 0x3b5   : > { %v1506_v56 = vpack.c.bf16 %v1481_v55, %v1480_v54  ;;  %2564 = vmatmul.msk.bf16.gmra.mxu3 %vm1125_vm1, %v3755_v9 }
 0x3b7   : > { %2603 = vmatmul.msk.bf16.gmra.mxu2 %vm919_vm0, %v1506_v56  ;;  %2619 = vmatmul.msk.bf16.gmra.mxu0 %vm919_vm0, %v1506_v56 }
 0x3b8   : > { %v1423_v58 = vpop.f32.mrf.mxu3 }
 0x3b9   : > { %v1424_v57 = vadd.f32 %v3762_v7, %v1423_v58 }
 0x3bb   : > { %v1482_v17 = vmax.f32 %v1424_v57, 0.0 }
 0x3c0   : > { %v1425_v59 = vpop.f32.mrf.mxu3 }
 0x3c1   : > { %v1426_v60 = vadd.f32 %v3762_v7, %v1425_v59 }
 0x3c3   : > { %v1483_v61 = vmax.f32 %v1426_v60, 0.0 }
 0x3c5   : > { %v1507_v63 = vpack.c.bf16 %v1483_v61, %v1482_v17 }
 0x3c7   : > { %2604 = vmatmul.msk.bf16.gmra.mxu2 %vm919_vm0, %v1507_v63  ;;  %2620 = vmatmul.msk.bf16.gmra.mxu0 %vm919_vm0, %v1507_v63 }
 0x3c8   : > { %v1428_v0 = vpop.f32.mrf.mxu3 }
 0x3c9   : > { %v1429_v15 = vadd.f32 %v3762_v7, %v1428_v0 }
 0x3cb   : > { %v1484_v9 = vmax.f32 %v1429_v15, 0.0 }
 0x3d0   : > { %v1430_v3 = vpop.f32.mrf.mxu3 }
 0x3d1   : > { %v1431_v36 = vadd.f32 %v3762_v7, %v1430_v3 }
 0x3d3   : > { %v1485_v5 = vmax.f32 %v1431_v36, 0.0 }
 0x3d4   : > { %v1716_v50 = vpop.f32.mrf.mxu0 }
 0x3d5   : > { %v1508_v8 = vpack.c.bf16 %v1485_v5, %v1484_v9  ;;  %v1717_v11 = vadd.f32 %v1716_v50, %v3815_v4 }
 0x3d7   : > { %v2630_v12 = vclamps-f32 %v1717_v11, 30.0  ;;  %2605 = vmatmul.msk.bf16.gmra.mxu2 %vm919_vm0, %v1508_v8  ;;  %2621 = vmatmul.msk.bf16.gmra.mxu0 %vm919_vm0, %v1508_v8 }
 0x3d8   : > { %v1433_v13 = vpop.f32.mrf.mxu3 }
 0x3d9   : > { %v1925_v1 = vsub.f32 0.0, %v2630_v12  ;;  %v1434_v19 = vadd.f32 %v3762_v7, %v1433_v13 }
 0x3da   : > { %v1627_v14 = vpop.f32.mrf.mxu2 }
 0x3db   : > { %v1990_v16 = vmul.f32 1.442695, %v1925_v1  ;;  %v1628_v26 = vadd.f32 %v1627_v14, %v3820_v38  ;;  %v1486_v29 = vmax.f32 %v1434_v19, 0.0 }
 0x3dc   : > { %v1718_v20 = vpop.f32.mrf.mxu0 }
 0x3dd   : > { %2803 = vpow2.f32 %v1990_v16  ;;  %v2629_v25 = vclamps-f32 %v1628_v26, 30.0  ;;  %v1719_v18 = vadd.f32 %v1718_v20, %v3815_v4 }
 0x3df   : > { %v1924_v21 = vsub.f32 0.0, %v2629_v25  ;;  %v2632_v22 = vclamps-f32 %v1719_v18, 30.0 }
 0x3e0   : > { %v1435_v23 = vpop.f32.mrf.mxu3 }
 0x3e1   : > { %v1988_v24 = vmul.f32 1.442695, %v1924_v21  ;;  %v1927_v27 = vsub.f32 0.0, %v2632_v22  ;;  %v1436_v28 = vadd.f32 %v3762_v7, %v1435_v23 }
 0x3e2   : > { %v1629_v30 = vpop.f32.mrf.mxu2 }
 0x3e3   : > { %v2804_v32 = vpop.eup %2803  ;;  %2805 = vpow2.f32 %v1988_v24  ;;  %v1994_v33 = vmul.f32 1.442695, %v1927_v27  ;;  %v1487_v34 = vmax.f32 %v1436_v28, 0.0  ;;  %v1630_v31 = vadd.f32 %v1629_v30, %v3820_v38 }
 0x3e4   : > { %v2117_v37 = vadd.f32 1.0, %v2804_v32  ;;  %v1721_v39 = vpop.f32.mrf.mxu0 }
 0x3e5   : > { %2807 = vpow2.f32 %v1994_v33  ;;  %v1509_v40 = vpack.c.bf16 %v1487_v34, %v1486_v29  ;;  %v2631_v49 = vclamps-f32 %v1630_v31, 30.0  ;;  %v1722_v35 = vadd.f32 %v1721_v39, %v3815_v4 }
 0x3e6   : > { %2809 = vrcp.f32 %v2117_v37 }
 0x3e7   : > { %v1926_v41 = vsub.f32 0.0, %v2631_v49  ;;  %v2634_v42 = vclamps-f32 %v1722_v35, 30.0  ;;  %2606 = vmatmul.msk.bf16.gmra.mxu2 %vm919_vm0, %v1509_v40  ;;  %2622 = vmatmul.msk.bf16.gmra.mxu0 %vm919_vm0, %v1509_v40 }
 0x3e8   : > { %v1438_v43 = vpop.f32.mrf.mxu3 }
 0x3e9   : > { %v2806_v62 = vpop.eup %2805  ;;  %v1992_v44 = vmul.f32 1.442695, %v1926_v41  ;;  %v1929_v45 = vsub.f32 0.0, %v2634_v42  ;;  %v1439_v56 = vadd.f32 %v3762_v7, %v1438_v43 }
 0x3ea   : > { %v2116_v46 = vadd.f32 1.0, %v2806_v62  ;;  %v1632_v47 = vpop.f32.mrf.mxu2 }
 0x3eb   : > { %v2808_v2 = vpop.eup %2807  ;;  %2811 = vpow2.f32 %v1992_v44  ;;  %v1998_v48 = vmul.f32 1.442695, %v1929_v45  ;;  %v1633_v6 = vadd.f32 %v1632_v47, %v3820_v38  ;;  %v1488_v15 = vmax.f32 %v1439_v56, 0.0 }
 0x3ec   : > { %v2810_v51 = vpop.eup %2809  ;;  %2813 = vrcp.f32 %v2116_v46  ;;  %v2119_v52 = vadd.f32 1.0, %v2808_v2  ;;  %v1723_v53 = vpop.f32.mrf.mxu0 }
 0x3ed   : > { %2245 = vst [vmem:[%s3833_s23 + $0x8] sm:$0xff] %v2810_v51  ;;  %2815 = vpow2.f32 %v1998_v48  ;;  %v2633_v54 = vclamps-f32 %v1633_v6, 30.0  ;;  %v1724_v55 = vadd.f32 %v1723_v53, %v3815_v4 }
 0x3ee   : > { %2817 = vrcp.f32 %v2119_v52 }
 0x3ef   : > { %v1928_v58 = vsub.f32 0.0, %v2633_v54  ;;  %v2636_v57 = vclamps-f32 %v1724_v55, 30.0 }
 0x3f0   : > { %v1440_v59 = vpop.f32.mrf.mxu3 }
 0x3f1   : > { %v2812_v60 = vpop.eup %2811  ;;  %v1996_v17 = vmul.f32 1.442695, %v1928_v58  ;;  %v1931_v61 = vsub.f32 0.0, %v2636_v57  ;;  %v1441_v63 = vadd.f32 %v3762_v7, %v1440_v59 }
 0x3f2   : > { %v2814_v0 = vpop.eup %2813  ;;  %v2118_v10 = vadd.f32 1.0, %v2812_v60  ;;  %v1634_v3 = vpop.f32.mrf.mxu2 }
 0x3f3   : > { %v2816_v36 = vpop.eup %2815  ;;  %2244 = vst [vmem:[%s3833_s23] sm:$0xff] %v2814_v0  ;;  %2819 = vpow2.f32 %v1996_v17  ;;  %v2002_v9 = vmul.f32 1.442695, %v1931_v61  ;;  %v1489_v5 = vmax.f32 %v1441_v63, 0.0  ;;  %v1635_v50 = vadd.f32 %v1634_v3, %v3820_v38 }
 0x3f4   : > { %v2818_v8 = vpop.eup %2817  ;;  %2821 = vrcp.f32 %v2118_v10  ;;  %v2121_v11 = vadd.f32 1.0, %v2816_v36  ;;  %v1726_v12 = vpop.f32.mrf.mxu0 }
 0x3f5   : > { %2247 = vst [vmem:[%s3833_s23 + $0x18] sm:$0xff] %v2818_v8  ;;  %2823 = vpow2.f32 %v2002_v9  ;;  %v1510_v13 = vpack.c.bf16 %v1489_v5, %v1488_v15  ;;  %v2635_v1 = vclamps-f32 %v1635_v50, 30.0  ;;  %v1727_v14 = vadd.f32 %v1726_v12, %v3815_v4 }
 0x3f6   : > { %2825 = vrcp.f32 %v2121_v11 }
 0x3f7   : > { %v1930_v16 = vsub.f32 0.0, %v2635_v1  ;;  %v2638_v26 = vclamps-f32 %v1727_v14, 30.0  ;;  %2607 = vmatmul.msk.bf16.gmra.mxu2 %vm919_vm0, %v1510_v13  ;;  %2623 = vmatmul.msk.bf16.gmra.mxu0 %vm919_vm0, %v1510_v13 }
 0x3f8   : > { %v1443_v20 = vpop.f32.mrf.mxu3 }
 0x3f9   : > { %v2820_v25 = vpop.eup %2819  ;;  %v2000_v18 = vmul.f32 1.442695, %v1930_v16  ;;  %v1933_v19 = vsub.f32 0.0, %v2638_v26  ;;  %v1444_v31 = vadd.f32 %v3762_v7, %v1443_v20 }
 0x3fa   : > { %v2822_v21 = vpop.eup %2821  ;;  %v2120_v22 = vadd.f32 1.0, %v2820_v25  ;;  %v1637_v23 = vpop.f32.mrf.mxu2 }
 0x3fb   : > { %v2824_v24 = vpop.eup %2823  ;;  %2246 = vst [vmem:[%s3833_s23 + $0x10] sm:$0xff] %v2822_v21  ;;  %2827 = vpow2.f32 %v2000_v18  ;;  %v2006_v27 = vmul.f32 1.442695, %v1933_v19  ;;  %v1638_v28 = vadd.f32 %v1637_v23, %v3820_v38  ;;  %v1490_v44 = vmax.f32 %v1444_v31, 0.0 }
 0x3fc   : > { %v2826_v29 = vpop.eup %2825  ;;  %2829 = vrcp.f32 %v2120_v22  ;;  %v2123_v30 = vadd.f32 1.0, %v2824_v24  ;;  %v1728_v32 = vpop.f32.mrf.mxu0 }
 0x3fd   : > { %2249 = vst [vmem:[%s3833_s23 + $0x28] sm:$0xff] %v2826_v29  ;;  %2831 = vpow2.f32 %v2006_v27  ;;  %v2637_v33 = vclamps-f32 %v1638_v28, 30.0  ;;  %v1729_v34 = vadd.f32 %v1728_v32, %v3815_v4 }
 0x3fe   : > { %2833 = vrcp.f32 %v2123_v30 }
 0x3ff   : > { %v1932_v37 = vsub.f32 0.0, %v2637_v33  ;;  %v2640_v39 = vclamps-f32 %v1729_v34, 30.0 }
 0x400   : > { %v1445_v40 = vpop.f32.mrf.mxu3 }
 0x401   : > { %v2828_v49 = vpop.eup %2827  ;;  %v2004_v35 = vmul.f32 1.442695, %v1932_v37  ;;  %v1935_v41 = vsub.f32 0.0, %v2640_v39  ;;  %v1446_v42 = vadd.f32 %v3762_v7, %v1445_v40 }
 0x402   : > { %v2830_v43 = vpop.eup %2829  ;;  %v2122_v62 = vadd.f32 1.0, %v2828_v49  ;;  %v1639_v45 = vpop.f32.mrf.mxu2 }
 0x403   : > { %v2832_v46 = vpop.eup %2831  ;;  %2248 = vst [vmem:[%s3833_s23 + $0x20] sm:$0xff] %v2830_v43  ;;  %2835 = vpow2.f32 %v2004_v35  ;;  %v2010_v47 = vmul.f32 1.442695, %v1935_v41  ;;  %v1491_v2 = vmax.f32 %v1446_v42, 0.0  ;;  %v1640_v48 = vadd.f32 %v1639_v45, %v3820_v38 }
 0x404   : > { %v2834_v6 = vpop.eup %2833  ;;  %2837 = vrcp.f32 %v2122_v62  ;;  %v2125_v51 = vadd.f32 1.0, %v2832_v46  ;;  %v1731_v52 = vpop.f32.mrf.mxu0 }
 0x405   : > { %2251 = vst [vmem:[%s3833_s23 + $0x38] sm:$0xff] %v2834_v6  ;;  %2839 = vpow2.f32 %v2010_v47  ;;  %v1511_v53 = vpack.c.bf16 %v1491_v2, %v1490_v44  ;;  %v2639_v54 = vclamps-f32 %v1640_v48, 30.0  ;;  %v1732_v55 = vadd.f32 %v1731_v52, %v3815_v4 }
 0x406   : > { %2841 = vrcp.f32 %v2125_v51 }
 0x407   : > { %v1934_v56 = vsub.f32 0.0, %v2639_v54  ;;  %v2642_v58 = vclamps-f32 %v1732_v55, 30.0  ;;  %2608 = vmatmul.msk.bf16.gmra.mxu2 %vm919_vm0, %v1511_v53  ;;  %2624 = vmatmul.msk.bf16.gmra.mxu0 %vm919_vm0, %v1511_v53 }
 0x408   : > { %v1448_v57 = vpop.f32.mrf.mxu3 }
 0x409   : > { %v2836_v59 = vpop.eup %2835  ;;  %v2008_v60 = vmul.f32 1.442695, %v1934_v56  ;;  %v1937_v17 = vsub.f32 0.0, %v2642_v58  ;;  %v1449_v11 = vadd.f32 %v3762_v7, %v1448_v57 }
 0x40a   : > { %v2838_v61 = vpop.eup %2837  ;;  %v2124_v63 = vadd.f32 1.0, %v2836_v59  ;;  %v1642_v0 = vpop.f32.mrf.mxu2 }
 0x40b   : > { %v2840_v10 = vpop.eup %2839  ;;  %2250 = vst [vmem:[%s3833_s23 + $0x30] sm:$0xff] %v2838_v61  ;;  %2843 = vpow2.f32 %v2008_v60  ;;  %v2014_v15 = vmul.f32 1.442695, %v1937_v17  ;;  %v1643_v3 = vadd.f32 %v1642_v0, %v3820_v38  ;;  %v1492_v19 = vmax.f32 %v1449_v11, 0.0 }
 0x40c   : > { %v2842_v36 = vpop.eup %2841  ;;  %2845 = vrcp.f32 %v2124_v63  ;;  %v2127_v9 = vadd.f32 1.0, %v2840_v10  ;;  %v1733_v5 = vpop.f32.mrf.mxu0 }
 0x40d   : > { %2253 = vst [vmem:[%s3833_s23 + $0x48] sm:$0xff] %v2842_v36  ;;  %2847 = vpow2.f32 %v2014_v15  ;;  %v2641_v50 = vclamps-f32 %v1643_v3, 30.0  ;;  %v1734_v8 = vadd.f32 %v1733_v5, %v3815_v4 }
 0x40e   : > { %2849 = vrcp.f32 %v2127_v9 }
 0x40f   : > { %v1936_v12 = vsub.f32 0.0, %v2641_v50  ;;  %v2644_v13 = vclamps-f32 %v1734_v8, 30.0 }
 0x410   : > { %v1450_v1 = vpop.f32.mrf.mxu3 }
 0x411   : > { %v2844_v14 = vpop.eup %2843  ;;  %v2012_v16 = vmul.f32 1.442695, %v1936_v12  ;;  %v1939_v26 = vsub.f32 0.0, %v2644_v13  ;;  %v1451_v20 = vadd.f32 %v3762_v7, %v1450_v1 }
 0x412   : > { %v2846_v25 = vpop.eup %2845  ;;  %v2126_v18 = vadd.f32 1.0, %v2844_v14  ;;  %v1644_v21 = vpop.f32.mrf.mxu2 }
 0x413   : > { %v2848_v22 = vpop.eup %2847  ;;  %2252 = vst [vmem:[%s3833_s23 + $0x40] sm:$0xff] %v2846_v25  ;;  %2851 = vpow2.f32 %v2012_v16  ;;  %v2018_v23 = vmul.f32 1.442695, %v1939_v26  ;;  %v1493_v24 = vmax.f32 %v1451_v20, 0.0  ;;  %v1645_v27 = vadd.f32 %v1644_v21, %v3820_v38 }
 0x414   : > { %v2850_v28 = vpop.eup %2849  ;;  %2853 = vrcp.f32 %v2126_v18  ;;  %v2129_v29 = vadd.f32 1.0, %v2848_v22  ;;  %v1736_v30 = vpop.f32.mrf.mxu0 }
 0x415   : > { %2255 = vst [vmem:[%s3833_s23 + $0x58] sm:$0xff] %v2850_v28  ;;  %2855 = vpow2.f32 %v2018_v23  ;;  %v1512_v32 = vpack.c.bf16 %v1493_v24, %v1492_v19  ;;  %v2643_v33 = vclamps-f32 %v1645_v27, 30.0  ;;  %v1737_v34 = vadd.f32 %v1736_v30, %v3815_v4 }
 0x416   : > { %2857 = vrcp.f32 %v2129_v29 }
 0x417   : > { %v1938_v31 = vsub.f32 0.0, %v2643_v33  ;;  %v2646_v37 = vclamps-f32 %v1737_v34, 30.0  ;;  %2609 = vmatmul.msk.bf16.gmra.mxu2 %vm919_vm0, %v1512_v32  ;;  %2625 = vmatmul.msk.bf16.gmra.mxu0 %vm919_vm0, %v1512_v32 }
 0x418   : > { %v1453_v39 = vpop.f32.mrf.mxu3 }
 0x419   : > { %v2852_v40 = vpop.eup %2851  ;;  %v2016_v49 = vmul.f32 1.442695, %v1938_v31  ;;  %v1941_v35 = vsub.f32 0.0, %v2646_v37  ;;  %v1454_v51 = vadd.f32 %v3762_v7, %v1453_v39 }
 0x41a   : > { %v2854_v41 = vpop.eup %2853  ;;  %v2128_v42 = vadd.f32 1.0, %v2852_v40  ;;  %v1647_v43 = vpop.f32.mrf.mxu2 }
 0x41b   : > { %v2856_v62 = vpop.eup %2855  ;;  %2254 = vst [vmem:[%s3833_s23 + $0x50] sm:$0xff] %v2854_v41  ;;  %2859 = vpow2.f32 %v2016_v49  ;;  %v2022_v44 = vmul.f32 1.442695, %v1941_v35  ;;  %v1648_v45 = vadd.f32 %v1647_v43, %v3820_v38  ;;  %v1494_v17 = vmax.f32 %v1454_v51, 0.0 }
 0x41c   : > { %v2858_v46 = vpop.eup %2857  ;;  %2861 = vrcp.f32 %v2128_v42  ;;  %v2131_v47 = vadd.f32 1.0, %v2856_v62  ;;  %v1738_v2 = vpop.f32.mrf.mxu0 }
 0x41d   : > { %2257 = vst [vmem:[%s3833_s23 + $0x68] sm:$0xff] %v2858_v46  ;;  %2863 = vpow2.f32 %v2022_v44  ;;  %v2645_v48 = vclamps-f32 %v1648_v45, 30.0  ;;  %v1739_v6 = vadd.f32 %v1738_v2, %v3815_v4 }
 0x41e   : > { %2865 = vrcp.f32 %v2131_v47 }
 0x41f   : > { %v1940_v52 = vsub.f32 0.0, %v2645_v48  ;;  %v2648_v53 = vclamps-f32 %v1739_v6, 30.0 }
 0x420   : > { %v1455_v54 = vpop.f32.mrf.mxu3 }
 0x421   : > { %v2860_v55 = vpop.eup %2859  ;;  %v2020_v56 = vmul.f32 1.442695, %v1940_v52  ;;  %v1943_v58 = vsub.f32 0.0, %v2648_v53  ;;  %v1456_v57 = vadd.f32 %v3762_v7, %v1455_v54 }
 0x422   : > { %v2862_v59 = vpop.eup %2861  ;;  %v2130_v60 = vadd.f32 1.0, %v2860_v55  ;;  %v1649_v61 = vpop.f32.mrf.mxu2 }
 0x423   : > { %v2864_v63 = vpop.eup %2863  ;;  %2256 = vst [vmem:[%s3833_s23 + $0x60] sm:$0xff] %v2862_v59  ;;  %2867 = vpow2.f32 %v2020_v56  ;;  %v2026_v0 = vmul.f32 1.442695, %v1943_v58  ;;  %v1495_v10 = vmax.f32 %v1456_v57, 0.0  ;;  %v1650_v15 = vadd.f32 %v1649_v61, %v3820_v38 }
 0x424   : > { %v2866_v3 = vpop.eup %2865  ;;  %2869 = vrcp.f32 %v2130_v60  ;;  %v2133_v36 = vadd.f32 1.0, %v2864_v63  ;;  %v1741_v9 = vpop.f32.mrf.mxu0 }
 0x425   : > { %2259 = vst [vmem:[%s3833_s23 + $0x78] sm:$0xff] %v2866_v3  ;;  %2871 = vpow2.f32 %v2026_v0  ;;  %v1513_v5 = vpack.c.bf16 %v1495_v10, %v1494_v17  ;;  %v2647_v50 = vclamps-f32 %v1650_v15, 30.0  ;;  %v1742_v8 = vadd.f32 %v1741_v9, %v3815_v4 }
 0x426   : > { %2873 = vrcp.f32 %v2133_v36 }
 0x427   : > { %v1942_v11 = vsub.f32 0.0, %v2647_v50  ;;  %v2650_v12 = vclamps-f32 %v1742_v8, 30.0  ;;  %2610 = vmatmul.msk.bf16.gmra.mxu2 %vm919_vm0, %v1513_v5  ;;  %2626 = vmatmul.msk.bf16.gmra.mxu0 %vm919_vm0, %v1513_v5 }
 0x428   : > { %v1458_v13 = vpop.f32.mrf.mxu3 }
 0x429   : > { %v2868_v1 = vpop.eup %2867  ;;  %v2024_v14 = vmul.f32 1.442695, %v1942_v11  ;;  %v1945_v16 = vsub.f32 0.0, %v2650_v12  ;;  %v1459_v29 = vadd.f32 %v3762_v7, %v1458_v13 }
 0x42a   : > { %v2870_v26 = vpop.eup %2869  ;;  %v2132_v20 = vadd.f32 1.0, %v2868_v1  ;;  %v1652_v25 = vpop.f32.mrf.mxu2 }
 0x42b   : > { %v2872_v18 = vpop.eup %2871  ;;  %2258 = vst [vmem:[%s3833_s23 + $0x70] sm:$0xff] %v2870_v26  ;;  %2875 = vpow2.f32 %v2024_v14  ;;  %v2030_v19 = vmul.f32 1.442695, %v1945_v16  ;;  %v1653_v21 = vadd.f32 %v1652_v25, %v3820_v38  ;;  %v1496_v35 = vmax.f32 %v1459_v29, 0.0 }
 0x42c   : > { %v2874_v22 = vpop.eup %2873  ;;  %2877 = vrcp.f32 %v2132_v20  ;;  %v2135_v23 = vadd.f32 1.0, %v2872_v18  ;;  %v1743_v24 = vpop.f32.mrf.mxu0 }
 0x42d   : > { %2261 = vst [vmem:[%s3833_s23 + $0x88] sm:$0xff] %v2874_v22  ;;  %2879 = vpow2.f32 %v2030_v19  ;;  %v2649_v27 = vclamps-f32 %v1653_v21, 30.0  ;;  %v1744_v28 = vadd.f32 %v1743_v24, %v3815_v4 }
 0x42e   : > { %2881 = vrcp.f32 %v2135_v23 }
 0x42f   : > { %v1944_v30 = vsub.f32 0.0, %v2649_v27  ;;  %v2652_v32 = vclamps-f32 %v1744_v28, 30.0 }
 0x430   : > { %v1460_v33 = vpop.f32.mrf.mxu3 }
 0x431   : > { %v2876_v34 = vpop.eup %2875  ;;  %v2028_v31 = vmul.f32 1.442695, %v1944_v30  ;;  %v1947_v37 = vsub.f32 0.0, %v2652_v32  ;;  %v1461_v39 = vadd.f32 %v3762_v7, %v1460_v33 }
 0x432   : > { %v2878_v40 = vpop.eup %2877  ;;  %v2134_v49 = vadd.f32 1.0, %v2876_v34  ;;  %v1654_v41 = vpop.f32.mrf.mxu2 }
 0x433   : > { %v2880_v42 = vpop.eup %2879  ;;  %2260 = vst [vmem:[%s3833_s23 + $0x80] sm:$0xff] %v2878_v40  ;;  %2883 = vpow2.f32 %v2028_v31  ;;  %v2034_v43 = vmul.f32 1.442695, %v1947_v37  ;;  %v1497_v62 = vmax.f32 %v1461_v39, 0.0  ;;  %v1655_v44 = vadd.f32 %v1654_v41, %v3820_v38 }
 0x434   : > { %v2882_v45 = vpop.eup %2881  ;;  %2885 = vrcp.f32 %v2134_v49  ;;  %v2137_v46 = vadd.f32 1.0, %v2880_v42  ;;  %v1746_v47 = vpop.f32.mrf.mxu0 }
 0x435   : > { %2263 = vst [vmem:[%s3833_s23 + $0x98] sm:$0xff] %v2882_v45  ;;  %2887 = vpow2.f32 %v2034_v43  ;;  %v1514_v2 = vpack.c.bf16 %v1497_v62, %v1496_v35  ;;  %v2651_v48 = vclamps-f32 %v1655_v44, 30.0  ;;  %v1747_v6 = vadd.f32 %v1746_v47, %v3815_v4 }
 0x436   : > { %2889 = vrcp.f32 %v2137_v46 }
 0x437   : > { %v1946_v51 = vsub.f32 0.0, %v2651_v48  ;;  %v2654_v52 = vclamps-f32 %v1747_v6, 30.0  ;;  %2611 = vmatmul.msk.bf16.gmra.mxu2 %vm919_vm0, %v1514_v2  ;;  %2627 = vmatmul.msk.bf16.gmra.mxu0 %vm919_vm0, %v1514_v2 }
 0x438   : > { %v1463_v53 = vpop.f32.mrf.mxu3 }
 0x439   : > { %v2884_v54 = vpop.eup %2883  ;;  %v2032_v55 = vmul.f32 1.442695, %v1946_v51  ;;  %v1949_v56 = vsub.f32 0.0, %v2654_v52  ;;  %v1464_v36 = vadd.f32 %v3762_v7, %v1463_v53 }
 0x43a   : > { %v2886_v58 = vpop.eup %2885  ;;  %v2136_v57 = vadd.f32 1.0, %v2884_v54  ;;  %v1657_v59 = vpop.f32.mrf.mxu2 }
 0x43b   : > { %v2888_v60 = vpop.eup %2887  ;;  %2262 = vst [vmem:[%s3833_s23 + $0x90] sm:$0xff] %v2886_v58  ;;  %2891 = vpow2.f32 %v2032_v55  ;;  %v2038_v17 = vmul.f32 1.442695, %v1949_v56  ;;  %v1658_v61 = vadd.f32 %v1657_v59, %v3820_v38  ;;  %v1498_v16 = vmax.f32 %v1464_v36, 0.0 }
 0x43c   : > { %v2890_v63 = vpop.eup %2889  ;;  %2893 = vrcp.f32 %v2136_v57  ;;  %v2139_v0 = vadd.f32 1.0, %v2888_v60  ;;  %v1748_v10 = vpop.f32.mrf.mxu0 }
 0x43d   : > { %2265 = vst [vmem:[%s3833_s23 + $0xa8] sm:$0xff] %v2890_v63  ;;  %2895 = vpow2.f32 %v2038_v17  ;;  %v2653_v15 = vclamps-f32 %v1658_v61, 30.0  ;;  %v1749_v3 = vadd.f32 %v1748_v10, %v3815_v4 }
 0x43e   : > { %2897 = vrcp.f32 %v2139_v0 }
 0x43f   : > { %v1948_v9 = vsub.f32 0.0, %v2653_v15  ;;  %v2656_v5 = vclamps-f32 %v1749_v3, 30.0 }
 0x440   : > { %v1465_v50 = vpop.f32.mrf.mxu3 }
 0x441   : > { %v2892_v8 = vpop.eup %2891  ;;  %v2036_v11 = vmul.f32 1.442695, %v1948_v9  ;;  %v1951_v12 = vsub.f32 0.0, %v2656_v5  ;;  %v1466_v13 = vadd.f32 %v3762_v7, %v1465_v50 }
 0x442   : > { %v2894_v1 = vpop.eup %2893  ;;  %v2138_v14 = vadd.f32 1.0, %v2892_v8  ;;  %v1659_v26 = vpop.f32.mrf.mxu2 }
 0x443   : > { %v2896_v20 = vpop.eup %2895  ;;  %2264 = vst [vmem:[%s3833_s23 + $0xa0] sm:$0xff] %v2894_v1  ;;  %2899 = vpow2.f32 %v2036_v11  ;;  %v2042_v25 = vmul.f32 1.442695, %v1951_v12  ;;  %v1499_v18 = vmax.f32 %v1466_v13, 0.0  ;;  %v1660_v19 = vadd.f32 %v1659_v26, %v3820_v38 }
 0x444   : > { %v2898_v21 = vpop.eup %2897  ;;  %2901 = vrcp.f32 %v2138_v14  ;;  %v2141_v22 = vadd.f32 1.0, %v2896_v20  ;;  %v1751_v23 = vpop.f32.mrf.mxu0 }
 0x445   : > { %2267 = vst [vmem:[%s3833_s23 + $0xb8] sm:$0xff] %v2898_v21  ;;  %2903 = vpow2.f32 %v2042_v25  ;;  %v1515_v24 = vpack.c.bf16 %v1499_v18, %v1498_v16  ;;  %v2655_v7 = vclamps-f32 %v1660_v19, 30.0  ;;  %v1752_v27 = vadd.f32 %v1751_v23, %v3815_v4 }
 0x446   : > { %2905 = vrcp.f32 %v2141_v22 }
 0x447   : > { %v1950_v28 = vsub.f32 0.0, %v2655_v7  ;;  %v2658_v29 = vclamps-f32 %v1752_v27, 30.0  ;;  %2612 = vmatmul.msk.bf16.gmra.mxu2 %vm919_vm0, %v1515_v24  ;;  %2628 = vmatmul.msk.bf16.gmra.mxu0 %vm919_vm0, %v1515_v24 }
 0x449   : > { %v2900_v30 = vpop.eup %2899  ;;  %v2040_v32 = vmul.f32 1.442695, %v1950_v28  ;;  %v1953_v33 = vsub.f32 0.0, %v2658_v29 }
 0x44a   : > { %v2902_v34 = vpop.eup %2901  ;;  %v2140_v31 = vadd.f32 1.0, %v2900_v30  ;;  %v1662_v37 = vpop.f32.mrf.mxu2 }
 0x44b   : > { %v2904_v39 = vpop.eup %2903  ;;  %2266 = vst [vmem:[%s3833_s23 + $0xb0] sm:$0xff] %v2902_v34  ;;  %2907 = vpow2.f32 %v2040_v32  ;;  %v2046_v40 = vmul.f32 1.442695, %v1953_v33  ;;  %v1663_v49 = vadd.f32 %v1662_v37, %v3820_v38 }
 0x44c   : > { %v2906_v35 = vpop.eup %2905  ;;  %2909 = vrcp.f32 %v2140_v31  ;;  %v2143_v41 = vadd.f32 1.0, %v2904_v39  ;;  %v1753_v42 = vpop.f32.mrf.mxu0 }
 0x44d   : > { %2269 = vst [vmem:[%s3833_s23 + $0xc8] sm:$0xff] %v2906_v35  ;;  %2911 = vpow2.f32 %v2046_v40  ;;  %v2657_v43 = vclamps-f32 %v1663_v49, 30.0  ;;  %v1754_v62 = vadd.f32 %v1753_v42, %v3815_v4 }
 0x44e   : > { %2913 = vrcp.f32 %v2143_v41 }
 0x44f   : > { %v1952_v44 = vsub.f32 0.0, %v2657_v43  ;;  %v2660_v45 = vclamps-f32 %v1754_v62, 30.0 }
 0x451   : > { %v2908_v46 = vpop.eup %2907  ;;  %v2044_v47 = vmul.f32 1.442695, %v1952_v44  ;;  %v1955_v2 = vsub.f32 0.0, %v2660_v45 }
 0x452   : > { %v2910_v48 = vpop.eup %2909  ;;  %v2142_v6 = vadd.f32 1.0, %v2908_v46  ;;  %v1664_v51 = vpop.f32.mrf.mxu2 }
 0x453   : > { %v2912_v52 = vpop.eup %2911  ;;  %2268 = vst [vmem:[%s3833_s23 + $0xc0] sm:$0xff] %v2910_v48  ;;  %2915 = vpow2.f32 %v2044_v47  ;;  %v2050_v53 = vmul.f32 1.442695, %v1955_v2  ;;  %v1665_v54 = vadd.f32 %v1664_v51, %v3820_v38 }
 0x454   : > { %v2914_v55 = vpop.eup %2913  ;;  %2917 = vrcp.f32 %v2142_v6  ;;  %v2145_v56 = vadd.f32 1.0, %v2912_v52  ;;  %v1756_v58 = vpop.f32.mrf.mxu0 }
 0x455   : > { %2271 = vst [vmem:[%s3833_s23 + $0xd8] sm:$0xff] %v2914_v55  ;;  %2919 = vpow2.f32 %v2050_v53  ;;  %v2659_v57 = vclamps-f32 %v1665_v54, 30.0  ;;  %v1757_v59 = vadd.f32 %v1756_v58, %v3815_v4 }
 0x456   : > { %2921 = vrcp.f32 %v2145_v56 }
 0x457   : > { %v1954_v60 = vsub.f32 0.0, %v2659_v57  ;;  %v2662_v17 = vclamps-f32 %v1757_v59, 30.0 }
 0x459   : > { %v2916_v61 = vpop.eup %2915  ;;  %v2048_v63 = vmul.f32 1.442695, %v1954_v60  ;;  %v1957_v0 = vsub.f32 0.0, %v2662_v17 }
 0x45a   : > { %v2918_v10 = vpop.eup %2917  ;;  %v2144_v15 = vadd.f32 1.0, %v2916_v61  ;;  %v1667_v3 = vpop.f32.mrf.mxu2 }
 0x45b   : > { %v2920_v36 = vpop.eup %2919  ;;  %2270 = vst [vmem:[%s3833_s23 + $0xd0] sm:$0xff] %v2918_v10  ;;  %2923 = vpow2.f32 %v2048_v63  ;;  %v2054_v9 = vmul.f32 1.442695, %v1957_v0  ;;  %v1668_v5 = vadd.f32 %v1667_v3, %v3820_v38 }
 0x45c   : > { %v2922_v50 = vpop.eup %2921  ;;  %2925 = vrcp.f32 %v2144_v15  ;;  %v2147_v8 = vadd.f32 1.0, %v2920_v36  ;;  %v1758_v11 = vpop.f32.mrf.mxu0 }
 0x45d   : > { %2273 = vst [vmem:[%s3833_s23 + $0xe8] sm:$0xff] %v2922_v50  ;;  %2927 = vpow2.f32 %v2054_v9  ;;  %v2661_v12 = vclamps-f32 %v1668_v5, 30.0  ;;  %v1759_v13 = vadd.f32 %v1758_v11, %v3815_v4 }
 0x45e   : > { %2929 = vrcp.f32 %v2147_v8 }
 0x45f   : > { %v1956_v1 = vsub.f32 0.0, %v2661_v12  ;;  %v2664_v14 = vclamps-f32 %v1759_v13, 30.0 }
 0x461   : > { %v2924_v16 = vpop.eup %2923  ;;  %v2052_v26 = vmul.f32 1.442695, %v1956_v1  ;;  %v1959_v20 = vsub.f32 0.0, %v2664_v14 }
 0x462   : > { %v2926_v25 = vpop.eup %2925  ;;  %v2146_v18 = vadd.f32 1.0, %v2924_v16  ;;  %v1669_v19 = vpop.f32.mrf.mxu2 }
 0x463   : > { %v2928_v21 = vpop.eup %2927  ;;  %2272 = vst [vmem:[%s3833_s23 + $0xe0] sm:$0xff] %v2926_v25  ;;  %2931 = vpow2.f32 %v2052_v26  ;;  %v2058_v22 = vmul.f32 1.442695, %v1959_v20  ;;  %v1670_v23 = vadd.f32 %v1669_v19, %v3820_v38 }
 0x464   : > { %v2930_v24 = vpop.eup %2929  ;;  %2933 = vrcp.f32 %v2146_v18  ;;  %v2149_v7 = vadd.f32 1.0, %v2928_v21  ;;  %v1761_v27 = vpop.f32.mrf.mxu0 }
 0x465   : > { %2275 = vst [vmem:[%s3833_s23 + $0xf8] sm:$0xff] %v2930_v24  ;;  %2935 = vpow2.f32 %v2058_v22  ;;  %v2663_v28 = vclamps-f32 %v1670_v23, 30.0  ;;  %v1762_v29 = vadd.f32 %v1761_v27, %v3815_v4 }
 0x466   : > { %2937 = vrcp.f32 %v2149_v7 }
 0x467   : > { %v1958_v30 = vsub.f32 0.0, %v2663_v28  ;;  %v2666_v32 = vclamps-f32 %v1762_v29, 30.0 }
 0x469   : > { %v2932_v33 = vpop.eup %2931  ;;  %v2056_v34 = vmul.f32 1.442695, %v1958_v30  ;;  %v1961_v31 = vsub.f32 0.0, %v2666_v32 }
 0x46a   : > { %v2934_v37 = vpop.eup %2933  ;;  %v2148_v39 = vadd.f32 1.0, %v2932_v33  ;;  %v1672_v40 = vpop.f32.mrf.mxu2 }
 0x46b   : > { %v2936_v49 = vpop.eup %2935  ;;  %2274 = vst [vmem:[%s3833_s23 + $0xf0] sm:$0xff] %v2934_v37  ;;  %2939 = vpow2.f32 %v2056_v34  ;;  %v2062_v35 = vmul.f32 1.442695, %v1961_v31  ;;  %v1673_v41 = vadd.f32 %v1672_v40, %v3820_v38 }
 0x46c   : > { %v2938_v42 = vpop.eup %2937  ;;  %2941 = vrcp.f32 %v2148_v39  ;;  %v2151_v43 = vadd.f32 1.0, %v2936_v49  ;;  %v1763_v62 = vpop.f32.mrf.mxu0 }
 0x46d   : > { %2277 = vst [vmem:[%s3833_s23 + $0x108] sm:$0xff] %v2938_v42  ;;  %2943 = vpow2.f32 %v2062_v35  ;;  %v2665_v44 = vclamps-f32 %v1673_v41, 30.0  ;;  %v1764_v45 = vadd.f32 %v1763_v62, %v3815_v4 }
 0x46e   : > { %2945 = vrcp.f32 %v2151_v43 }
 0x46f   : > { %v1960_v46 = vsub.f32 0.0, %v2665_v44  ;;  %v2668_v47 = vclamps-f32 %v1764_v45, 30.0 }
 0x471   : > { %v2940_v2 = vpop.eup %2939  ;;  %v2060_v48 = vmul.f32 1.442695, %v1960_v46  ;;  %v1963_v6 = vsub.f32 0.0, %v2668_v47 }
 0x472   : > { %v2942_v51 = vpop.eup %2941  ;;  %v2150_v52 = vadd.f32 1.0, %v2940_v2  ;;  %v1674_v53 = vpop.f32.mrf.mxu2 }
 0x473   : > { %v2944_v54 = vpop.eup %2943  ;;  %2276 = vst [vmem:[%s3833_s23 + $0x100] sm:$0xff] %v2942_v51  ;;  %2947 = vpow2.f32 %v2060_v48  ;;  %v2066_v55 = vmul.f32 1.442695, %v1963_v6  ;;  %v1675_v56 = vadd.f32 %v1674_v53, %v3820_v38 }
 0x474   : > { %v2946_v58 = vpop.eup %2945  ;;  %2949 = vrcp.f32 %v2150_v52  ;;  %v2153_v57 = vadd.f32 1.0, %v2944_v54  ;;  %v1766_v59 = vpop.f32.mrf.mxu0 }
 0x475   : > { %2279 = vst [vmem:[%s3833_s23 + $0x118] sm:$0xff] %v2946_v58  ;;  %2951 = vpow2.f32 %v2066_v55  ;;  %v2667_v60 = vclamps-f32 %v1675_v56, 30.0  ;;  %v1767_v17 = vadd.f32 %v1766_v59, %v3815_v4 }
 0x476   : > { %2953 = vrcp.f32 %v2153_v57 }
 0x477   : > { %v1962_v61 = vsub.f32 0.0, %v2667_v60  ;;  %v2670_v63 = vclamps-f32 %v1767_v17, 30.0 }
 0x479   : > { %v2948_v0 = vpop.eup %2947  ;;  %v2064_v10 = vmul.f32 1.442695, %v1962_v61  ;;  %v1965_v15 = vsub.f32 0.0, %v2670_v63 }
 0x47a   : > { %v2950_v3 = vpop.eup %2949  ;;  %v2152_v36 = vadd.f32 1.0, %v2948_v0  ;;  %v1677_v9 = vpop.f32.mrf.mxu2 }
 0x47b   : > { %v2952_v5 = vpop.eup %2951  ;;  %2278 = vst [vmem:[%s3833_s23 + $0x110] sm:$0xff] %v2950_v3  ;;  %2955 = vpow2.f32 %v2064_v10  ;;  %v2070_v50 = vmul.f32 1.442695, %v1965_v15  ;;  %v1678_v8 = vadd.f32 %v1677_v9, %v3820_v38 }
 0x47c   : > { %v2954_v11 = vpop.eup %2953  ;;  %2957 = vrcp.f32 %v2152_v36  ;;  %v2155_v12 = vadd.f32 1.0, %v2952_v5  ;;  %v1768_v13 = vpop.f32.mrf.mxu0 }
 0x47d   : > { %2281 = vst [vmem:[%s3833_s23 + $0x128] sm:$0xff] %v2954_v11  ;;  %2959 = vpow2.f32 %v2070_v50  ;;  %v2669_v1 = vclamps-f32 %v1678_v8, 30.0  ;;  %v1769_v14 = vadd.f32 %v1768_v13, %v3815_v4 }
 0x47e   : > { %2961 = vrcp.f32 %v2155_v12 }
 0x47f   : > { %v1964_v16 = vsub.f32 0.0, %v2669_v1  ;;  %v2672_v26 = vclamps-f32 %v1769_v14, 30.0 }
 0x481   : > { %v2956_v20 = vpop.eup %2955  ;;  %v2068_v25 = vmul.f32 1.442695, %v1964_v16  ;;  %v1967_v18 = vsub.f32 0.0, %v2672_v26 }
 0x482   : > { %v2958_v19 = vpop.eup %2957  ;;  %v2154_v21 = vadd.f32 1.0, %v2956_v20  ;;  %v1679_v22 = vpop.f32.mrf.mxu2 }
 0x483   : > { %v2960_v23 = vpop.eup %2959  ;;  %2280 = vst [vmem:[%s3833_s23 + $0x120] sm:$0xff] %v2958_v19  ;;  %2963 = vpow2.f32 %v2068_v25  ;;  %v2074_v24 = vmul.f32 1.442695, %v1967_v18  ;;  %v1680_v7 = vadd.f32 %v1679_v22, %v3820_v38 }
 0x484   : > { %v2962_v27 = vpop.eup %2961  ;;  %2965 = vrcp.f32 %v2154_v21  ;;  %v2157_v28 = vadd.f32 1.0, %v2960_v23  ;;  %v1771_v29 = vpop.f32.mrf.mxu0 }
 0x485   : > { %2283 = vst [vmem:[%s3833_s23 + $0x138] sm:$0xff] %v2962_v27  ;;  %2967 = vpow2.f32 %v2074_v24  ;;  %v2671_v30 = vclamps-f32 %v1680_v7, 30.0  ;;  %v1772_v32 = vadd.f32 %v1771_v29, %v3815_v4 }
 0x486   : > { %2969 = vrcp.f32 %v2157_v28 }
 0x487   : > { %v1966_v33 = vsub.f32 0.0, %v2671_v30  ;;  %v2674_v34 = vclamps-f32 %v1772_v32, 30.0 }
 0x489   : > { %v2964_v31 = vpop.eup %2963  ;;  %v2072_v37 = vmul.f32 1.442695, %v1966_v33  ;;  %v1969_v39 = vsub.f32 0.0, %v2674_v34 }
 0x48a   : > { %v2966_v40 = vpop.eup %2965  ;;  %v2156_v49 = vadd.f32 1.0, %v2964_v31  ;;  %v1682_v35 = vpop.f32.mrf.mxu2 }
 0x48b   : > { %v2968_v41 = vpop.eup %2967  ;;  %2282 = vst [vmem:[%s3833_s23 + $0x130] sm:$0xff] %v2966_v40  ;;  %2971 = vpow2.f32 %v2072_v37  ;;  %v2078_v42 = vmul.f32 1.442695, %v1969_v39  ;;  %v1683_v43 = vadd.f32 %v1682_v35, %v3820_v38 }
 0x48c   : > { %v2970_v62 = vpop.eup %2969  ;;  %2973 = vrcp.f32 %v2156_v49  ;;  %v2159_v44 = vadd.f32 1.0, %v2968_v41  ;;  %v1773_v45 = vpop.f32.mrf.mxu0 }
 0x48d   : > { %2285 = vst [vmem:[%s3833_s23 + $0x148] sm:$0xff] %v2970_v62  ;;  %2975 = vpow2.f32 %v2078_v42  ;;  %v2673_v46 = vclamps-f32 %v1683_v43, 30.0  ;;  %v1774_v47 = vadd.f32 %v1773_v45, %v3815_v4 }
 0x48e   : > { %2977 = vrcp.f32 %v2159_v44 }
 0x48f   : > { %v1968_v2 = vsub.f32 0.0, %v2673_v46  ;;  %v2676_v48 = vclamps-f32 %v1774_v47, 30.0 }
 0x491   : > { %v2972_v6 = vpop.eup %2971  ;;  %v2076_v51 = vmul.f32 1.442695, %v1968_v2  ;;  %v1971_v52 = vsub.f32 0.0, %v2676_v48 }
 0x492   : > { %v2974_v53 = vpop.eup %2973  ;;  %v2158_v54 = vadd.f32 1.0, %v2972_v6  ;;  %v1684_v55 = vpop.f32.mrf.mxu2 }
 0x493   : > { %v2976_v56 = vpop.eup %2975  ;;  %2284 = vst [vmem:[%s3833_s23 + $0x140] sm:$0xff] %v2974_v53  ;;  %2979 = vpow2.f32 %v2076_v51  ;;  %v2082_v58 = vmul.f32 1.442695, %v1971_v52  ;;  %v1685_v57 = vadd.f32 %v1684_v55, %v3820_v38 }
 0x494   : > { %v2978_v59 = vpop.eup %2977  ;;  %2981 = vrcp.f32 %v2158_v54  ;;  %v2161_v60 = vadd.f32 1.0, %v2976_v56  ;;  %v1776_v17 = vpop.f32.mrf.mxu0 }
 0x495   : > { %2287 = vst [vmem:[%s3833_s23 + $0x158] sm:$0xff] %v2978_v59  ;;  %2983 = vpow2.f32 %v2082_v58  ;;  %v2675_v61 = vclamps-f32 %v1685_v57, 30.0  ;;  %v1777_v63 = vadd.f32 %v1776_v17, %v3815_v4 }
 0x496   : > { %2985 = vrcp.f32 %v2161_v60 }
 0x497   : > { %v1970_v0 = vsub.f32 0.0, %v2675_v61  ;;  %v2678_v10 = vclamps-f32 %v1777_v63, 30.0 }
 0x499   : > { %v2980_v15 = vpop.eup %2979  ;;  %v2080_v3 = vmul.f32 1.442695, %v1970_v0  ;;  %v1973_v36 = vsub.f32 0.0, %v2678_v10 }
 0x49a   : > { %v2982_v9 = vpop.eup %2981  ;;  %v2160_v5 = vadd.f32 1.0, %v2980_v15  ;;  %v1687_v50 = vpop.f32.mrf.mxu2 }
 0x49b   : > { %v2984_v8 = vpop.eup %2983  ;;  %2286 = vst [vmem:[%s3833_s23 + $0x150] sm:$0xff] %v2982_v9  ;;  %2987 = vpow2.f32 %v2080_v3  ;;  %v2086_v11 = vmul.f32 1.442695, %v1973_v36  ;;  %v1688_v12 = vadd.f32 %v1687_v50, %v3820_v38 }
 0x49c   : > { %v2986_v13 = vpop.eup %2985  ;;  %2989 = vrcp.f32 %v2160_v5  ;;  %v2163_v1 = vadd.f32 1.0, %v2984_v8  ;;  %v1778_v14 = vpop.f32.mrf.mxu0 }
 0x49d   : > { %2289 = vst [vmem:[%s3833_s23 + $0x168] sm:$0xff] %v2986_v13  ;;  %2991 = vpow2.f32 %v2086_v11  ;;  %v2677_v16 = vclamps-f32 %v1688_v12, 30.0  ;;  %v1779_v26 = vadd.f32 %v1778_v14, %v3815_v4 }
 0x49e   : > { %2993 = vrcp.f32 %v2163_v1 }
 0x49f   : > { %v1972_v20 = vsub.f32 0.0, %v2677_v16  ;;  %v2680_v25 = vclamps-f32 %v1779_v26, 30.0 }
 0x4a1   : > { %v2988_v18 = vpop.eup %2987  ;;  %v2084_v19 = vmul.f32 1.442695, %v1972_v20  ;;  %v1975_v21 = vsub.f32 0.0, %v2680_v25 }
 0x4a2   : > { %v2990_v22 = vpop.eup %2989  ;;  %v2162_v23 = vadd.f32 1.0, %v2988_v18  ;;  %v1689_v24 = vpop.f32.mrf.mxu2 }
 0x4a3   : > { %v2992_v7 = vpop.eup %2991  ;;  %2288 = vst [vmem:[%s3833_s23 + $0x160] sm:$0xff] %v2990_v22  ;;  %2995 = vpow2.f32 %v2084_v19  ;;  %v2090_v27 = vmul.f32 1.442695, %v1975_v21  ;;  %v1690_v28 = vadd.f32 %v1689_v24, %v3820_v38 }
 0x4a4   : > { %v2994_v29 = vpop.eup %2993  ;;  %2997 = vrcp.f32 %v2162_v23  ;;  %v2165_v30 = vadd.f32 1.0, %v2992_v7  ;;  %v1781_v32 = vpop.f32.mrf.mxu0 }
 0x4a5   : > { %2291 = vst [vmem:[%s3833_s23 + $0x178] sm:$0xff] %v2994_v29  ;;  %2999 = vpow2.f32 %v2090_v27  ;;  %v2679_v33 = vclamps-f32 %v1690_v28, 30.0  ;;  %v1782_v34 = vadd.f32 %v1781_v32, %v3815_v4 }
 0x4a6   : > { %3001 = vrcp.f32 %v2165_v30 }
 0x4a7   : > { %v1974_v31 = vsub.f32 0.0, %v2679_v33  ;;  %v2682_v37 = vclamps-f32 %v1782_v34, 30.0 }
 0x4a9   : > { %v2996_v39 = vpop.eup %2995  ;;  %v2088_v40 = vmul.f32 1.442695, %v1974_v31  ;;  %v1977_v49 = vsub.f32 0.0, %v2682_v37 }
 0x4aa   : > { %v2998_v35 = vpop.eup %2997  ;;  %v2164_v41 = vadd.f32 1.0, %v2996_v39  ;;  %v1692_v42 = vpop.f32.mrf.mxu2 }
 0x4ab   : > { %v3000_v43 = vpop.eup %2999  ;;  %2290 = vst [vmem:[%s3833_s23 + $0x170] sm:$0xff] %v2998_v35  ;;  %3003 = vpow2.f32 %v2088_v40  ;;  %v2094_v62 = vmul.f32 1.442695, %v1977_v49  ;;  %v1693_v44 = vadd.f32 %v1692_v42, %v3820_v38 }
 0x4ac   : > { %v3002_v45 = vpop.eup %3001  ;;  %3005 = vrcp.f32 %v2164_v41  ;;  %v2167_v46 = vadd.f32 1.0, %v3000_v43  ;;  %v1783_v47 = vpop.f32.mrf.mxu0 }
 0x4ad   : > { %2293 = vst [vmem:[%s3833_s23 + $0x188] sm:$0xff] %v3002_v45  ;;  %3007 = vpow2.f32 %v2094_v62  ;;  %v2681_v2 = vclamps-f32 %v1693_v44, 30.0  ;;  %v1784_v48 = vadd.f32 %v1783_v47, %v3815_v4 }
 0x4ae   : > { %3009 = vrcp.f32 %v2167_v46 }
 0x4af   : > { %v1976_v6 = vsub.f32 0.0, %v2681_v2  ;;  %v2684_v51 = vclamps-f32 %v1784_v48, 30.0 }
 0x4b1   : > { %v3004_v52 = vpop.eup %3003  ;;  %v2092_v53 = vmul.f32 1.442695, %v1976_v6  ;;  %v1979_v54 = vsub.f32 0.0, %v2684_v51 }
 0x4b2   : > { %v3006_v55 = vpop.eup %3005  ;;  %v2166_v56 = vadd.f32 1.0, %v3004_v52  ;;  %v1694_v58 = vpop.f32.mrf.mxu2 }
 0x4b3   : > { %v3008_v57 = vpop.eup %3007  ;;  %2292 = vst [vmem:[%s3833_s23 + $0x180] sm:$0xff] %v3006_v55  ;;  %3011 = vpow2.f32 %v2092_v53  ;;  %v2098_v59 = vmul.f32 1.442695, %v1979_v54  ;;  %v1695_v60 = vadd.f32 %v1694_v58, %v3820_v38 }
 0x4b4   : > { %v3010_v17 = vpop.eup %3009  ;;  %3013 = vrcp.f32 %v2166_v56  ;;  %v2169_v61 = vadd.f32 1.0, %v3008_v57  ;;  %v1786_v63 = vpop.f32.mrf.mxu0 }
 0x4b5   : > { %2295 = vst [vmem:[%s3833_s23 + $0x198] sm:$0xff] %v3010_v17  ;;  %3015 = vpow2.f32 %v2098_v59  ;;  %v2683_v0 = vclamps-f32 %v1695_v60, 30.0  ;;  %v1787_v10 = vadd.f32 %v1786_v63, %v3815_v4 }
 0x4b6   : > { %3017 = vrcp.f32 %v2169_v61 }
 0x4b7   : > { %v1978_v15 = vsub.f32 0.0, %v2683_v0  ;;  %v2686_v3 = vclamps-f32 %v1787_v10, 30.0 }
 0x4b9   : > { %v3012_v36 = vpop.eup %3011  ;;  %v2096_v9 = vmul.f32 1.442695, %v1978_v15  ;;  %v1981_v5 = vsub.f32 0.0, %v2686_v3 }
 0x4ba   : > { %v3014_v50 = vpop.eup %3013  ;;  %v2168_v8 = vadd.f32 1.0, %v3012_v36  ;;  %v1697_v11 = vpop.f32.mrf.mxu2 }
 0x4bb   : > { %v3016_v12 = vpop.eup %3015  ;;  %2294 = vst [vmem:[%s3833_s23 + $0x190] sm:$0xff] %v3014_v50  ;;  %3019 = vpow2.f32 %v2096_v9  ;;  %v2102_v13 = vmul.f32 1.442695, %v1981_v5  ;;  %v1698_v1 = vadd.f32 %v1697_v11, %v3820_v38 }
 0x4bc   : > { %v3018_v14 = vpop.eup %3017  ;;  %3021 = vrcp.f32 %v2168_v8  ;;  %v2171_v16 = vadd.f32 1.0, %v3016_v12  ;;  %v1788_v26 = vpop.f32.mrf.mxu0 }
 0x4bd   : > { %2297 = vst [vmem:[%s3833_s23 + $0x1a8] sm:$0xff] %v3018_v14  ;;  %3023 = vpow2.f32 %v2102_v13  ;;  %v2685_v20 = vclamps-f32 %v1698_v1, 30.0  ;;  %v1789_v25 = vadd.f32 %v1788_v26, %v3815_v4 }
 0x4be   : > { %3025 = vrcp.f32 %v2171_v16 }
 0x4bf   : > { %v1980_v18 = vsub.f32 0.0, %v2685_v20  ;;  %v2688_v19 = vclamps-f32 %v1789_v25, 30.0 }
 0x4c1   : > { %v3020_v21 = vpop.eup %3019  ;;  %v2100_v22 = vmul.f32 1.442695, %v1980_v18  ;;  %v1983_v23 = vsub.f32 0.0, %v2688_v19 }
 0x4c2   : > { %v3022_v24 = vpop.eup %3021  ;;  %v2170_v7 = vadd.f32 1.0, %v3020_v21  ;;  %v1699_v27 = vpop.f32.mrf.mxu2 }
 0x4c3   : > { %v3024_v28 = vpop.eup %3023  ;;  %2296 = vst [vmem:[%s3833_s23 + $0x1a0] sm:$0xff] %v3022_v24  ;;  %3027 = vpow2.f32 %v2100_v22  ;;  %v2106_v29 = vmul.f32 1.442695, %v1983_v23  ;;  %v1700_v30 = vadd.f32 %v1699_v27, %v3820_v38 }
 0x4c4   : > { %v3026_v32 = vpop.eup %3025  ;;  %3029 = vrcp.f32 %v2170_v7  ;;  %v2173_v33 = vadd.f32 1.0, %v3024_v28  ;;  %v1791_v34 = vpop.f32.mrf.mxu0 }
 0x4c5   : > { %2299 = vst [vmem:[%s3833_s23 + $0x1b8] sm:$0xff] %v3026_v32  ;;  %3031 = vpow2.f32 %v2106_v29  ;;  %v2687_v31 = vclamps-f32 %v1700_v30, 30.0  ;;  %v1792_v37 = vadd.f32 %v1791_v34, %v3815_v4 }
 0x4c6   : > { %3033 = vrcp.f32 %v2173_v33 }
 0x4c7   : > { %v1982_v39 = vsub.f32 0.0, %v2687_v31  ;;  %v2690_v40 = vclamps-f32 %v1792_v37, 30.0 }
 0x4c9   : > { %v3028_v49 = vpop.eup %3027  ;;  %v2104_v35 = vmul.f32 1.442695, %v1982_v39  ;;  %v1985_v41 = vsub.f32 0.0, %v2690_v40 }
 0x4ca   : > { %v3030_v42 = vpop.eup %3029  ;;  %v2172_v43 = vadd.f32 1.0, %v3028_v49  ;;  %v1702_v62 = vpop.f32.mrf.mxu2 }
 0x4cb   : > { %v3032_v44 = vpop.eup %3031  ;;  %2298 = vst [vmem:[%s3833_s23 + $0x1b0] sm:$0xff] %v3030_v42  ;;  %3035 = vpow2.f32 %v2104_v35  ;;  %v2110_v45 = vmul.f32 1.442695, %v1985_v41  ;;  %v1703_v46 = vadd.f32 %v1702_v62, %v3820_v38 }
 0x4cc   : > { %v3034_v47 = vpop.eup %3033  ;;  %3037 = vrcp.f32 %v2172_v43  ;;  %v2175_v2 = vadd.f32 1.0, %v3032_v44  ;;  %v1793_v48 = vpop.f32.mrf.mxu0 }
 0x4cd   : > { %2301 = vst [vmem:[%s3833_s23 + $0x1c8] sm:$0xff] %v3034_v47  ;;  %3039 = vpow2.f32 %v2110_v45  ;;  %v2689_v6 = vclamps-f32 %v1703_v46, 30.0  ;;  %v1794_v51 = vadd.f32 %v1793_v48, %v3815_v4 }
 0x4ce   : > { %3041 = vrcp.f32 %v2175_v2 }
 0x4cf   : > { %v1984_v52 = vsub.f32 0.0, %v2689_v6  ;;  %v2692_v53 = vclamps-f32 %v1794_v51, 30.0 }
 0x4d1   : > { %v3036_v54 = vpop.eup %3035  ;;  %v2108_v55 = vmul.f32 1.442695, %v1984_v52  ;;  %v1987_v56 = vsub.f32 0.0, %v2692_v53 }
 0x4d2   : > { %v3038_v58 = vpop.eup %3037  ;;  %v2174_v57 = vadd.f32 1.0, %v3036_v54  ;;  %v1704_v59 = vpop.f32.mrf.mxu2 }
 0x4d3   : > { %v3040_v60 = vpop.eup %3039  ;;  %2300 = vst [vmem:[%s3833_s23 + $0x1c0] sm:$0xff] %v3038_v58  ;;  %3043 = vpow2.f32 %v2108_v55  ;;  %v2114_v17 = vmul.f32 1.442695, %v1987_v56  ;;  %v1705_v61 = vadd.f32 %v1704_v59, %v3820_v38 }
 0x4d4   : > { %v3042_v63 = vpop.eup %3041  ;;  %3045 = vrcp.f32 %v2174_v57  ;;  %v2177_v4 = vadd.f32 1.0, %v3040_v60 }
 0x4d5   : > { %2303 = vst [vmem:[%s3833_s23 + $0x1d8] sm:$0xff] %v3042_v63  ;;  %3047 = vpow2.f32 %v2114_v17  ;;  %v2691_v0 = vclamps-f32 %v1705_v61, 30.0 }
 0x4d6   : > { %3049 = vrcp.f32 %v2177_v4 }
 0x4d7   : > { %v1986_v10 = vsub.f32 0.0, %v2691_v0 }
 0x4d9   : > { %v3044_v15 = vpop.eup %3043  ;;  %v2112_v3 = vmul.f32 1.442695, %v1986_v10 }
 0x4da   : > { %v3046_v36 = vpop.eup %3045  ;;  %v2176_v9 = vadd.f32 1.0, %v3044_v15 }
 0x4db   : > { %v3048_v5 = vpop.eup %3047  ;;  %2302 = vst [vmem:[%s3833_s23 + $0x1d0] sm:$0xff] %v3046_v36  ;;  %3051 = vpow2.f32 %v2112_v3 }
 0x4dc   : > { %v3050_v38 = vpop.eup %3049  ;;  %3053 = vrcp.f32 %v2176_v9  ;;  %v2179_v50 = vadd.f32 1.0, %v3048_v5 }
 0x4dd   : > { %2305 = vst [vmem:[%s3833_s23 + $0x1e8] sm:$0xff] %v3050_v38 }
 0x4de   : > { %3055 = vrcp.f32 %v2179_v50 }
 0x4e1   : > { %v3052_v8 = vpop.eup %3051 }
 0x4e2   : > { %v3054_v11 = vpop.eup %3053  ;;  %v2178_v12 = vadd.f32 1.0, %v3052_v8 }
 0x4e3   : > { %2304 = vst [vmem:[%s3833_s23 + $0x1e0] sm:$0xff] %v3054_v11 }
 0x4e4   : > { %v3056_v13 = vpop.eup %3055  ;;  %3057 = vrcp.f32 %v2178_v12 }
 0x4e5   : > { %2307 = vst [vmem:[%s3833_s23 + $0x1f8] sm:$0xff] %v3056_v13 }
 0x4e7   : > { %2315 = sbr.rel (!%p3287_p9) target bundleno = 1292 (0x50c), region = 72 }
 0x4ea   : > { %v3058_v1 = vpop.eup %3057 }
 0x4eb   : > { %2306 = vst [vmem:[%s3833_s23 + $0x1f0] sm:$0xff] %v3058_v1 }
 0x4ec   : > { %s4090_s22 = smov (!%p2318_p6, %s2317_s22), 32 }
 0x4ed   : > { %s2739_s25 = sshll.u32 %s4090_s22, 4 }
 0x4ee   : > { %s2322_s26 = ssub.s32 512, %s2739_s25 }
 0x4ef   : > { %s2323_s17 = sshll.u32 %s2322_s26, 4 }
 0x4f0   : > { %2324 = vsyncadd %s2309_s13, %s2323_s17  ;;  %p3990_p11 = scmp.ne.s32.totalorder %s2739_s25, 0  ;;  %s2741_s24 = sshll.u32 %s3264_s21, 9 }
 0x4f1   : > { %s4077_s15 = sld [smem:[#allocation13_spill]]  ;;  %s2330_s29 = sshll.u32 %s3833_s23, 4  ;;  %s3999_s29 = int_to_ptr.vmem [resolvable:$true] %s2330_s29 }
 0x4f2   : > { %s4064_s19 = sshll.u32 %s4090_s22, 8  ;;  %s3098_s16 = sshra.s32 %s3999_s29, 4  ;;  %s3099_s16 = int_to_ptr.vmem [resolvable:$true] %s3098_s16 }
 0x4f3   : > { %s3100_s25 = sshrl.u32 %s4064_s19, 4  ;;  %s3180_s21 = smov [#allocation5]  }
 0x4f4   : > { %s3105_s26 = scalar_lea.vmem %s3099_s16, %s3100_s25  ;;  %s3109_s17 = scalar_lea.vmem %s3180_s21, 1024 }
 0x4f5   : > { %p3106_p9 = scmp.ne.s32.totalorder %s3099_s16, %s3105_s26  ;;  %p3111_p7 = scmp.lt.s32.totalorder %s3109_s17, %s3105_s26 }
 0x4f7   : > { %s2328_s12 = scalar_lea.hbm %s4077_s15, %s2741_s24  ;;  %p3107_p13 = pnand %p3106_p9, %p3990_p11 }
 0x4f8   : > { %s2332_s27 = sshll.u32 %s2328_s12, 4  ;;  %s4001_s27 = int_to_ptr.hbm [resolvable:$true] %s2332_s27 }
 0x4f9   : > { %p3108_p5 = pneg %p3107_p13 }
 0x4fb   : > { %p3113_p8 = pnand %p3111_p7, %p3108_p5 }
 0x4fd   : > { %3116 = shalt.err (!%p3113_p8)
}
 0x4fe   : > { %s3117_s23 = sshra.s32 %s4001_s27, 4  ;;  %s3128_s12 = scalar_lea.hbm %s4077_s15, 1008  ;;  %s3118_s23 = int_to_ptr.hbm [resolvable:$true] %s3117_s23 }
 0x4ff   : > { %s3124_s24 = scalar_lea.hbm %s3118_s23, %s3100_s25  ;;  %p3129_p2 = scmp.lt.s32.totalorder %s3118_s23, %s4077_s15 }
 0x500   : > { %p3125_p12 = scmp.ne.s32.totalorder %s3118_s23, %s3124_s24  ;;  %p3130_p3 = scmp.lt.s32.totalorder %s3128_s12, %s3124_s24 }
 0x502   : > { %p3126_p0 = pnand %p3125_p12, %p3990_p11  ;;  %p3131_p4 = por %p3130_p3, %p3129_p2 }
 0x504   : > { %p3127_p1 = pneg %p3126_p0 }
 0x506   : > { %p3132_p6 = pnand %p3131_p4, %p3127_p1 }
 0x508   : > { %3135 = shalt.err (!%p3132_p6)
}
 0x509   : > { %s3181_s26 = smov 256   ;;  %s3182_s25 = smov 16  }
 0x50a   : > { %s4078_s21 = sshll.u32 %s4090_s22, 8 }
 0x50b   : > { %2338 = dma.vmem_to_hbm [thread:$0]  (%p3990_p11), %s3999_s29, %s4078_s21, %s4001_s27, %s2309_s13, %s3181_s26, %s3181_s26, %s3182_s25  }
 0x50c PF: > { %s4079_s17 = sld [smem:[#allocation8_spill]]  ;;  %p4081_p9 = scmp.ge.s32.totalorder %s3175_s20, 2 }
 0x50e   : > { %p2759_p13 = pnand %p4081_p9, %p3291_p10 }
 0x510   : > { %p2760_p5 = pneg %p2759_p13 }
 0x512   : > { %s2347_s23 = sand.u32 1, %s4079_s17  }
 0x513   : > { %s2348_s24 = scalar_lea.sflag [#allocation4], %s2347_s23 }
 0x514   : > { %3158 = dma.done.wait (%p2760_p5), %s2348_s24, 8192  }
 0x515   : > { %3160 = vsyncadd (%p2760_p5), %s2348_s24, 4294959104  ;;  %s4082_s20 = sld [smem:[#allocation10_spill]]  ;;  %s4085_s17 = smov %s3167_s18 }
 0x516   : > { %s4083_s30 = sld [smem:[#allocation9_spill]] }
 0x517   : > { %s4084_s19 = sld [smem:[#allocation11_spill]] }
 0x51b   : > { %p24_p7 = scmp.ge.s32.totalorder %s4082_s20, 4  }
 0x51c   : > { %s4086_s18 = smov %s4083_s30 }
 0x51d   :  { %26 = sbr.rel (!%p24_p7) target bundleno = 7 (0x7), region = 109 }
 0x522   :  { %2354 = vsyncpa [#allocation3], 1 }
 0x523   :  { %2356 = vsyncpa [#allocation3 + $0x1], 1 }
 0x524   :  { %2357 = vsyncpa [#allocation4], 1 }
 0x525   :  { %2359 = vsyncpa [#allocation4 + $0x1], 1 }

</bundles_post_ra>
